<compile_context>
chip_gen: v5e
topology: v5e:2x2
jax: 0.10.0
libtpu: 0.0.40
codegen_flags: <defaults>
</compile_context>

<pallas_src>
import jax
import jax.numpy as jnp
from jax.experimental import pallas as pl
from jax.experimental.pallas import tpu as pltpu

# ---- model hyper-parameters (small synthetic shapes) ------------------------
B, C, H, W = 2, 3, 16, 16          # input images, NCHW
P = 8                              # patch size
HP, WP = H // P, W // P
N = HP * WP                        # tokens per image
CPP = C * P * P                    # im2col row length
D = 32                             # hidden size
HEADS = 2
HD = D // HEADS                    # head dim
MLP = 64                           # MLP hidden
LAYERS = 2                         # encoder depth
HEAD_MID = 16                      # depth-head hidden


def _ln(x, w, b, eps=1e-6):
    mu = jnp.mean(x, axis=-1, keepdims=True)
    var = jnp.mean((x - mu) ** 2, axis=-1, keepdims=True)
    return (x - mu) * jax.lax.rsqrt(var + eps) * w + b


# ---- single fused kernel (one grid step == one image) ------------------------
def fused_forward_kernel(scal_ref, patches_ref, w_pe_ref, bpos_ref,
                         wqkv_ref, bqkv_ref, wo_ref, dvec_ref,
                         w1_ref, b1_ref, w2_ref, hw1_ref, up_ref, o_ref):
    f32 = jnp.float32
    bf16 = jnp.bfloat16

    # ---- preprocess: global min-max normalize.  min/max were reduced in the
    #      wrapper (cross-image reduce would serialize the batch grid);
    #      ImageNet mean/std are folded into w_pe / bpos on the host.
    mn = scal_ref[0]
    inv = scal_ref[1]
    xp = patches_ref[0]                                   # (N, C*P*P) f32
    xn = (xp - mn) * inv

    # ---- patch embedding (Conv2d k=P stride=P as matmul) + bias + pos embed ----
    tok = jnp.dot(xn.astype(bf16), w_pe_ref[...],
                  preferred_element_type=f32) + bpos_ref[...]     # (N, D) f32

    scale = 1.0 / float(HD) ** 0.5

    # ---- transformer encoder: static unroll (LAYERS=2). For deep models this
    #      would become a layer-streamed pipeline over the stacked layer axis.
    for l in range(LAYERS):
        lv = dvec_ref[l]                                  # (6, D) f32
        ln1w, ln1b, bo = lv[0:1], lv[1:2], lv[2:3]
        ln2w, ln2b, b2 = lv[3:4], lv[4:5], lv[5:6]

        # --- LN1 + MHSA: one fused QKV matmul, per-head softmax, single Wo ---
        h1 = _ln(tok, ln1w, ln1b)
        qkv = jnp.dot(h1.astype(bf16), wqkv_ref[l],
                      preferred_element_type=f32) + bqkv_ref[l]   # (N, 3D) f32
        head_out = []
        for hh in range(HEADS):                           # static, tiny loop
            q = qkv[:, hh * HD:(hh + 1) * HD]
            k = qkv[:, D + hh * HD:D + (hh + 1) * HD]
            v = qkv[:, 2 * D + hh * HD:2 * D + (hh + 1) * HD]
            s = jax.lax.dot_general(q.astype(bf16), k.astype(bf16),
                                    (((1,), (1,)), ((), ())),
                                    preferred_element_type=f32) * scale  # (N, N)
            s = s - jnp.max(s, axis=-1, keepdims=True)
            p = jnp.exp(s)
            p = p * pl.reciprocal(jnp.sum(p, axis=-1, keepdims=True), approx=True)
            head_out.append(jnp.dot(p.astype(bf16), v.astype(bf16),
                                    preferred_element_type=f32))         # (N, HD)
        cat = jnp.concatenate(head_out, axis=-1)                          # (N, D)
        tok = tok + jnp.dot(cat.astype(bf16), wo_ref[l],
                            preferred_element_type=f32) + bo

        # --- LN2 + MLP (GELU) ---
        h2 = _ln(tok, ln2w, ln2b)
        m = jnp.dot(h2.astype(bf16), w1_ref[l],
                    preferred_element_type=f32) + b1_ref[l]
        # TODO(synk): PyTorch/DINOv2 use exact erf GELU; tanh approximation here.
        m = jax.nn.gelu(m, approximate=True)
        m = jnp.dot(m.astype(bf16), w2_ref[l],
                    preferred_element_type=f32) + b2
        tok = tok + m

    # ---- depth head: LN -> MLP -> ReLU, per-patch depth ----
    hv = dvec_ref[LAYERS]                                 # (6, D) head vectors
    hd = _ln(tok, hv[0:1], hv[1:2])
    hd = jnp.maximum(jnp.dot(hd.astype(bf16), hw1_ref[...],
                             preferred_element_type=f32)
                     + hv[2:3, 0:HEAD_MID], 0.0)          # (N, HEAD_MID)
    d = jax.lax.dot_general(hv[3:4, 0:HEAD_MID], hd,
                            (((1,), (1,)), ((), ())),
                            preferred_element_type=f32) + hv[4:5, 0:1]   # (1, N)
    d = jnp.maximum(d, 0.0)

    # ---- nearest-neighbor upsample to full resolution (lane-dense store) ----
    # TODO(synk): the real DPT head uses bilinear interpolation + conv stack.
    o_ref[...] = jnp.dot(d, up_ref[...],
                         preferred_element_type=f32).reshape(1, 1, H * W)


# ---- wrapper -----------------------------------------------------------------
def depth_forward(x, w):
    # im2col of the raw NCHW input (pure permutation; preprocessing math happens
    # in-kernel).
    # TODO(synk): HF processor bilinear resize is skipped (input assumed
    # patch-aligned); at real resolutions express im2col via BlockSpec index_map.
    patches = (x.reshape(B, C, HP, P, WP, P)
                 .transpose(0, 2, 4, 1, 3, 5)
                 .reshape(B, N, CPP))
    # global min-max (torch .min()/.max() over the whole batch tensor) — hoisted
    # out of the kernel so the batch grid axis can run in parallel (v7x 2 TCs).
    mn = jnp.min(x)
    mx = jnp.max(x)
    scal = jnp.stack([mn, 1.0 / (mx - mn + 1e-8)])

    out = pl.pallas_call(
        fused_forward_kernel,
        grid=(B,),
        out_shape=jax.ShapeDtypeStruct((B, 1, H * W), jnp.float32),
        in_specs=[
            pl.BlockSpec(memory_space=pltpu.MemorySpace.SMEM),     # scal (2,)
            pl.BlockSpec((1, N, CPP), lambda b: (b, 0, 0)),        # patches
        ] + [pl.BlockSpec(memory_space=pltpu.MemorySpace.VMEM)] * 11,
        out_specs=pl.BlockSpec((1, 1, H * W), lambda b: (b, 0, 0)),
        compiler_params=pltpu.CompilerParams(
            dimension_semantics=("parallel",)),
    )(scal, patches, *w)
    return out.reshape(B, H, W)


depth_forward_jit = jax.jit(depth_forward)


# ---- deterministic parameter init (module-style weights) ---------------------
def init_params(key):
    def nrm(k, shape, scale=0.02):
        return (scale * jax.random.normal(k, shape)).astype(jnp.float32)

    keys = jax.random.split(key, 4 + LAYERS)
    params = {
        "img_mean": jnp.array([0.485, 0.456, 0.406], jnp.float32),
        "img_std": jnp.array([0.229, 0.224, 0.225], jnp.float32),
        "patch_w": nrm(keys[0], (CPP, D)),
        "patch_b": jnp.zeros((1, D), jnp.float32),
        "pos": nrm(keys[1], (N, D)),
        "head_ln_w": jnp.ones((1, D), jnp.float32),
        "head_ln_b": jnp.zeros((1, D), jnp.float32),
        "head_w1": nrm(keys[2], (D, HEAD_MID)),
        "head_b1": jnp.zeros((1, HEAD_MID), jnp.float32),
        "head_w2": nrm(keys[3], (1, HEAD_MID)),
        "head_b2": jnp.zeros((1, 1), jnp.float32),
        "layers": [],
    }
    for i in range(LAYERS):
        k0, k1, k2, k3 = jax.random.split(keys[4 + i], 4)
        params["layers"].append({
            "ln1_w": jnp.ones((1, D), jnp.float32),
            "ln1_b": jnp.zeros((1, D), jnp.float32),
            "wqkv": nrm(k0, (D, 3 * D)),
            "bqkv": jnp.zeros((1, 3 * D), jnp.float32),
            "wo": nrm(k1, (D, D)),
            "bo": jnp.zeros((1, D), jnp.float32),
            "ln2_w": jnp.ones((1, D), jnp.float32),
            "ln2_b": jnp.zeros((1, D), jnp.float32),
            "w1": nrm(k2, (D, MLP)),
            "b1": jnp.zeros((1, MLP), jnp.float32),
            "w2": nrm(k3, (MLP, D)),
            "b2": jnp.zeros((1, D), jnp.float32),
        })
    return params


# ---- one-time host-side packing into kernel-friendly slabs -------------------
def pack_params(p):
    bf16 = jnp.bfloat16

    # fold ImageNet mean/std (per im2col column) into the patch-embed weight/bias
    mean_row = jnp.repeat(p["img_mean"], P * P)            # (C*P*P,)
    std_row = jnp.repeat(p["img_std"], P * P)
    w_pe = (p["patch_w"] / std_row[:, None]).astype(bf16)            # (CPP, D)
    b_eff = p["patch_b"][0] - (mean_row / std_row) @ p["patch_w"]    # (D,)
    bpos = (p["pos"] + b_eff[None, :]).astype(jnp.float32)           # (N, D)

    def stack(name):
        return jnp.stack([lp[name] for lp in p["layers"]])

    wqkv = stack("wqkv").astype(bf16)                      # (L, D, 3D)
    bqkv = stack("bqkv").reshape(LAYERS, 3 * D)            # (L, 3D)  f32
    wo = stack("wo").astype(bf16)                          # (L, D, D)
    w1 = stack("w1").astype(bf16)                          # (L, D, MLP)
    b1 = stack("b1").reshape(LAYERS, MLP)                  # (L, MLP) f32
    w2 = stack("w2").astype(bf16)                          # (L, MLP, D)

    # per-layer (1,D) vectors with a leading layer axis (aligned loads):
    # rows = [ln1_w, ln1_b, bo, ln2_w, ln2_b, b2]
    dvec = jnp.stack([
        jnp.concatenate([lp["ln1_w"], lp["ln1_b"], lp["bo"],
                         lp["ln2_w"], lp["ln2_b"], lp["b2"]], axis=0)
        for lp in p["layers"]])                            # (L, 6, D)

    # extra "layer" row holds the depth-head vectors (zero-padded to D lanes)
    def pad_d(v):
        return jnp.pad(v, ((0, 0), (0, D - v.shape[1])))
    head_row = jnp.concatenate([
        p["head_ln_w"], p["head_ln_b"],
        pad_d(p["head_b1"]), pad_d(p["head_w2"]), pad_d(p["head_b2"]),
        jnp.zeros((1, D), jnp.float32)], axis=0)[None]     # (1, 6, D)
    dvec = jnp.concatenate([dvec, head_row], axis=0)       # (L+1, 6, D)

    hw1 = p["head_w1"].astype(bf16)                        # (D, HEAD_MID)

    # per-image nearest-upsample 0/1 matrix: (N, H*W)
    n = jnp.arange(N)
    hp = n // WP
    wp = n % WP
    pix = jnp.arange(H * W)
    prow = pix // W
    pcol = pix % W
    up = ((prow[None, :] // P == hp[:, None]) &
          (pcol[None, :] // P == wp[:, None])).astype(jnp.float32)

    return (w_pe, bpos, wqkv, bqkv, wo, dvec, w1, b1, w2, hw1, up)


if __name__ == "__main__":
    key = jax.random.PRNGKey(0)
    kx, kp = jax.random.split(key)
    x = jax.random.uniform(kx, (B, C, H, W), jnp.float32)   # NCHW, like PyTorch
    params = init_params(kp)
    packed = pack_params(params)

    depth = depth_forward_jit(x, packed)
    jax.block_until_ready(depth)
    assert depth.shape == (B, H, W) and depth.dtype == jnp.float32
    assert bool(jnp.all(jnp.isfinite(depth)))
    print("KERNEL_OK")
</pallas_src>

<mosaic_0001>
module attributes {stable_mosaic.version = 11 : i64} {
  func.func @fused_forward_kernel(%arg0: i32, %arg1: memref<2xf32, #tpu.memory_space<smem>>, %arg2: memref<1x4x192xf32, #tpu.memory_space<vmem>>, %arg3: memref<192x32xbf16, #tpu.memory_space<vmem>>, %arg4: memref<4x32xf32, #tpu.memory_space<vmem>>, %arg5: memref<2x32x96xbf16, #tpu.memory_space<vmem>>, %arg6: memref<2x96xf32, #tpu.memory_space<vmem>>, %arg7: memref<2x32x32xbf16, #tpu.memory_space<vmem>>, %arg8: memref<3x6x32xf32, #tpu.memory_space<vmem>>, %arg9: memref<2x32x64xbf16, #tpu.memory_space<vmem>>, %arg10: memref<2x64xf32, #tpu.memory_space<vmem>>, %arg11: memref<2x64x32xbf16, #tpu.memory_space<vmem>>, %arg12: memref<32x16xbf16, #tpu.memory_space<vmem>>, %arg13: memref<4x256xf32, #tpu.memory_space<vmem>>, %arg14: memref<1x1x256xf32, #tpu.memory_space<vmem>>) attributes {dimension_semantics = [#tpu.dimension_semantics<parallel>], iteration_bounds = array<i64: 2>, scalar_prefetch = 0 : i64, scratch_operands = 0 : i64, tpu.core_type = #tpu.core_type<tc>, window_params = [{transform_indices = @transform_0, window_bounds = array<i64: 2>}, {transform_indices = @transform_1, window_bounds = array<i64: 1, 4, 192>}, {pipeline_mode = #tpu.pipeline_mode<synchronous>, transform_indices = @transform_2, window_bounds = array<i64: 192, 32>}, {pipeline_mode = #tpu.pipeline_mode<synchronous>, transform_indices = @transform_3, window_bounds = array<i64: 4, 32>}, {pipeline_mode = #tpu.pipeline_mode<synchronous>, transform_indices = @transform_4, window_bounds = array<i64: 2, 32, 96>}, {pipeline_mode = #tpu.pipeline_mode<synchronous>, transform_indices = @transform_5, window_bounds = array<i64: 2, 96>}, {pipeline_mode = #tpu.pipeline_mode<synchronous>, transform_indices = @transform_6, window_bounds = array<i64: 2, 32, 32>}, {pipeline_mode = #tpu.pipeline_mode<synchronous>, transform_indices = @transform_7, window_bounds = array<i64: 3, 6, 32>}, {pipeline_mode = #tpu.pipeline_mode<synchronous>, transform_indices = @transform_8, window_bounds = array<i64: 2, 32, 64>}, {pipeline_mode = #tpu.pipeline_mode<synchronous>, transform_indices = @transform_9, window_bounds = array<i64: 2, 64>}, {pipeline_mode = #tpu.pipeline_mode<synchronous>, transform_indices = @transform_10, window_bounds = array<i64: 2, 64, 32>}, {pipeline_mode = #tpu.pipeline_mode<synchronous>, transform_indices = @transform_11, window_bounds = array<i64: 32, 16>}, {pipeline_mode = #tpu.pipeline_mode<synchronous>, transform_indices = @transform_12, window_bounds = array<i64: 4, 256>}, {transform_indices = @transform_13, window_bounds = array<i64: 1, 1, 256>}]} {
    %c0 = arith.constant 0 : index
    %0 = memref.load %arg1[%c0] : memref<2xf32, #tpu.memory_space<smem>>
    %c1 = arith.constant 1 : index
    %1 = memref.load %arg1[%c1] : memref<2xf32, #tpu.memory_space<smem>>
    %c0_0 = arith.constant 0 : index
    %c0_1 = arith.constant 0 : index
    %c0_2 = arith.constant 0 : index
    %2 = vector.load %arg2[%c0_0, %c0_1, %c0_2] : memref<1x4x192xf32, #tpu.memory_space<vmem>>, vector<1x4x192xf32>
    %3 = vector.shape_cast %2 : vector<1x4x192xf32> to vector<4x192xf32>
    %4 = vector.broadcast %0 : f32 to vector<4x192xf32>
    %5 = arith.subf %3, %4 : vector<4x192xf32>
    %6 = vector.broadcast %1 : f32 to vector<4x192xf32>
    %7 = arith.mulf %5, %6 : vector<4x192xf32>
    %8 = arith.truncf %7 : vector<4x192xf32> to vector<4x192xbf16>
    %c0_3 = arith.constant 0 : index
    %c0_4 = arith.constant 0 : index
    %9 = vector.load %arg3[%c0_3, %c0_4] : memref<192x32xbf16, #tpu.memory_space<vmem>>, vector<192x32xbf16>
    %cst = arith.constant dense<0.000000e+00> : vector<4x32xf32>
    %10 = tpu.matmul %8, %9, %cst {dimension_numbers = #tpu.dot_dimension_numbers<[1], [0], [0], [1], [0, 0, 1, 1], [], []>} : vector<4x192xbf16>, vector<192x32xbf16>, vector<4x32xf32> -> vector<4x32xf32>
    %c0_5 = arith.constant 0 : index
    %c0_6 = arith.constant 0 : index
    %11 = vector.load %arg4[%c0_5, %c0_6] : memref<4x32xf32, #tpu.memory_space<vmem>>, vector<4x32xf32>
    %12 = arith.addf %10, %11 : vector<4x32xf32>
    %c0_7 = arith.constant 0 : index
    %c0_8 = arith.constant 0 : index
    %c0_9 = arith.constant 0 : index
    %13 = vector.load %arg8[%c0_7, %c0_8, %c0_9] : memref<3x6x32xf32, #tpu.memory_space<vmem>>, vector<1x6x32xf32>
    %14 = vector.shape_cast %13 : vector<1x6x32xf32> to vector<6x32xf32>
    %15 = vector.extract_strided_slice %14 {offsets = [0, 0], sizes = [1, 32], strides = [1, 1]} : vector<6x32xf32> to vector<1x32xf32>
    %16 = vector.extract_strided_slice %14 {offsets = [1, 0], sizes = [1, 32], strides = [1, 1]} : vector<6x32xf32> to vector<1x32xf32>
    %17 = vector.extract_strided_slice %14 {offsets = [2, 0], sizes = [1, 32], strides = [1, 1]} : vector<6x32xf32> to vector<1x32xf32>
    %18 = vector.extract_strided_slice %14 {offsets = [3, 0], sizes = [1, 32], strides = [1, 1]} : vector<6x32xf32> to vector<1x32xf32>
    %19 = vector.extract_strided_slice %14 {offsets = [4, 0], sizes = [1, 32], strides = [1, 1]} : vector<6x32xf32> to vector<1x32xf32>
    %20 = vector.extract_strided_slice %14 {offsets = [5, 0], sizes = [1, 32], strides = [1, 1]} : vector<6x32xf32> to vector<1x32xf32>
    %cst_10 = arith.constant dense<0.000000e+00> : vector<4xf32>
    %21 = vector.multi_reduction <add>, %12, %cst_10 [1] : vector<4x32xf32> to vector<4xf32>
    %22 = vector.shape_cast %21 : vector<4xf32> to vector<4x1xf32>
    %cst_11 = arith.constant 3.200000e+01 : f32
    %23 = vector.broadcast %cst_11 : f32 to vector<4x1xf32>
    %24 = arith.divf %22, %23 : vector<4x1xf32>
    %25 = vector.broadcast %24 : vector<4x1xf32> to vector<4x32xf32>
    %26 = arith.subf %12, %25 : vector<4x32xf32>
    %27 = arith.mulf %26, %26 : vector<4x32xf32>
    %cst_12 = arith.constant dense<0.000000e+00> : vector<4xf32>
    %28 = vector.multi_reduction <add>, %27, %cst_12 [1] : vector<4x32xf32> to vector<4xf32>
    %29 = vector.shape_cast %28 : vector<4xf32> to vector<4x1xf32>
    %cst_13 = arith.constant 3.200000e+01 : f32
    %30 = vector.broadcast %cst_13 : f32 to vector<4x1xf32>
    %31 = arith.divf %29, %30 : vector<4x1xf32>
    %32 = vector.broadcast %24 : vector<4x1xf32> to vector<4x32xf32>
    %33 = arith.subf %12, %32 : vector<4x32xf32>
    %cst_14 = arith.constant 9.99999997E-7 : f32
    %34 = vector.broadcast %cst_14 : f32 to vector<4x1xf32>
    %35 = arith.addf %31, %34 : vector<4x1xf32>
    %36 = math.rsqrt %35 : vector<4x1xf32>
    %37 = vector.broadcast %36 : vector<4x1xf32> to vector<4x32xf32>
    %38 = arith.mulf %33, %37 : vector<4x32xf32>
    %39 = vector.broadcast %15 : vector<1x32xf32> to vector<4x32xf32>
    %40 = arith.mulf %38, %39 : vector<4x32xf32>
    %41 = vector.broadcast %16 : vector<1x32xf32> to vector<4x32xf32>
    %42 = arith.addf %40, %41 : vector<4x32xf32>
    %43 = arith.truncf %42 : vector<4x32xf32> to vector<4x32xbf16>
    %c0_15 = arith.constant 0 : index
    %c0_16 = arith.constant 0 : index
    %c0_17 = arith.constant 0 : index
    %44 = vector.load %arg5[%c0_15, %c0_16, %c0_17] : memref<2x32x96xbf16, #tpu.memory_space<vmem>>, vector<1x32x96xbf16>
    %45 = vector.shape_cast %44 : vector<1x32x96xbf16> to vector<32x96xbf16>
    %cst_18 = arith.constant dense<0.000000e+00> : vector<4x96xf32>
    %46 = tpu.matmul %43, %45, %cst_18 {dimension_numbers = #tpu.dot_dimension_numbers<[1], [0], [0], [1], [0, 0, 1, 1], [], []>} : vector<4x32xbf16>, vector<32x96xbf16>, vector<4x96xf32> -> vector<4x96xf32>
    %c0_19 = arith.constant 0 : index
    %c0_20 = arith.constant 0 : index
    %47 = vector.load %arg6[%c0_19, %c0_20] : memref<2x96xf32, #tpu.memory_space<vmem>>, vector<1x96xf32>
    %48 = vector.shape_cast %47 : vector<1x96xf32> to vector<96xf32>
    %49 = vector.shape_cast %48 : vector<96xf32> to vector<1x96xf32>
    %50 = vector.broadcast %49 : vector<1x96xf32> to vector<4x96xf32>
    %51 = arith.addf %46, %50 : vector<4x96xf32>
    %52 = vector.extract_strided_slice %51 {offsets = [0, 0], sizes = [4, 16], strides = [1, 1]} : vector<4x96xf32> to vector<4x16xf32>
    %53 = vector.extract_strided_slice %51 {offsets = [0, 32], sizes = [4, 16], strides = [1, 1]} : vector<4x96xf32> to vector<4x16xf32>
    %54 = vector.extract_strided_slice %51 {offsets = [0, 64], sizes = [4, 16], strides = [1, 1]} : vector<4x96xf32> to vector<4x16xf32>
    %55 = arith.truncf %52 : vector<4x16xf32> to vector<4x16xbf16>
    %56 = arith.truncf %53 : vector<4x16xf32> to vector<4x16xbf16>
    %cst_21 = arith.constant dense<0.000000e+00> : vector<4x4xf32>
    %57 = tpu.matmul %55, %56, %cst_21 {dimension_numbers = #tpu.dot_dimension_numbers<[1], [1], [0], [0], [0, 0, 1, 0], [], []>} : vector<4x16xbf16>, vector<4x16xbf16>, vector<4x4xf32> -> vector<4x4xf32>
    %cst_22 = arith.constant 2.500000e-01 : f32
    %58 = vector.broadcast %cst_22 : f32 to vector<4x4xf32>
    %59 = arith.mulf %57, %58 : vector<4x4xf32>
    %cst_23 = arith.constant dense<0xFF800000> : vector<4xf32>
    %60 = vector.multi_reduction <maximumf>, %59, %cst_23 [1] : vector<4x4xf32> to vector<4xf32>
    %61 = vector.shape_cast %60 : vector<4xf32> to vector<4x1xf32>
    %62 = vector.broadcast %61 : vector<4x1xf32> to vector<4x4xf32>
    %63 = arith.subf %59, %62 : vector<4x4xf32>
    %64 = math.exp %63 : vector<4x4xf32>
    %cst_24 = arith.constant dense<0.000000e+00> : vector<4xf32>
    %65 = vector.multi_reduction <add>, %64, %cst_24 [1] : vector<4x4xf32> to vector<4xf32>
    %66 = vector.shape_cast %65 : vector<4xf32> to vector<4x1xf32>
    %67 = tpu.reciprocal %66 {approx = true} : vector<4x1xf32> -> vector<4x1xf32>
    %68 = vector.broadcast %67 : vector<4x1xf32> to vector<4x4xf32>
    %69 = arith.mulf %64, %68 : vector<4x4xf32>
    %70 = arith.truncf %69 : vector<4x4xf32> to vector<4x4xbf16>
    %71 = arith.truncf %54 : vector<4x16xf32> to vector<4x16xbf16>
    %cst_25 = arith.constant dense<0.000000e+00> : vector<4x16xf32>
    %72 = tpu.matmul %70, %71, %cst_25 {dimension_numbers = #tpu.dot_dimension_numbers<[1], [0], [0], [1], [0, 0, 1, 1], [], []>} : vector<4x4xbf16>, vector<4x16xbf16>, vector<4x16xf32> -> vector<4x16xf32>
    %73 = vector.extract_strided_slice %51 {offsets = [0, 16], sizes = [4, 16], strides = [1, 1]} : vector<4x96xf32> to vector<4x16xf32>
    %74 = vector.extract_strided_slice %51 {offsets = [0, 48], sizes = [4, 16], strides = [1, 1]} : vector<4x96xf32> to vector<4x16xf32>
    %75 = vector.extract_strided_slice %51 {offsets = [0, 80], sizes = [4, 16], strides = [1, 1]} : vector<4x96xf32> to vector<4x16xf32>
    %76 = arith.truncf %73 : vector<4x16xf32> to vector<4x16xbf16>
    %77 = arith.truncf %74 : vector<4x16xf32> to vector<4x16xbf16>
    %cst_26 = arith.constant dense<0.000000e+00> : vector<4x4xf32>
    %78 = tpu.matmul %76, %77, %cst_26 {dimension_numbers = #tpu.dot_dimension_numbers<[1], [1], [0], [0], [0, 0, 1, 0], [], []>} : vector<4x16xbf16>, vector<4x16xbf16>, vector<4x4xf32> -> vector<4x4xf32>
    %cst_27 = arith.constant 2.500000e-01 : f32
    %79 = vector.broadcast %cst_27 : f32 to vector<4x4xf32>
    %80 = arith.mulf %78, %79 : vector<4x4xf32>
    %cst_28 = arith.constant dense<0xFF800000> : vector<4xf32>
    %81 = vector.multi_reduction <maximumf>, %80, %cst_28 [1] : vector<4x4xf32> to vector<4xf32>
    %82 = vector.shape_cast %81 : vector<4xf32> to vector<4x1xf32>
    %83 = vector.broadcast %82 : vector<4x1xf32> to vector<4x4xf32>
    %84 = arith.subf %80, %83 : vector<4x4xf32>
    %85 = math.exp %84 : vector<4x4xf32>
    %cst_29 = arith.constant dense<0.000000e+00> : vector<4xf32>
    %86 = vector.multi_reduction <add>, %85, %cst_29 [1] : vector<4x4xf32> to vector<4xf32>
    %87 = vector.shape_cast %86 : vector<4xf32> to vector<4x1xf32>
    %88 = tpu.reciprocal %87 {approx = true} : vector<4x1xf32> -> vector<4x1xf32>
    %89 = vector.broadcast %88 : vector<4x1xf32> to vector<4x4xf32>
    %90 = arith.mulf %85, %89 : vector<4x4xf32>
    %91 = arith.truncf %90 : vector<4x4xf32> to vector<4x4xbf16>
    %92 = arith.truncf %75 : vector<4x16xf32> to vector<4x16xbf16>
    %cst_30 = arith.constant dense<0.000000e+00> : vector<4x16xf32>
    %93 = tpu.matmul %91, %92, %cst_30 {dimension_numbers = #tpu.dot_dimension_numbers<[1], [0], [0], [1], [0, 0, 1, 1], [], []>} : vector<4x4xbf16>, vector<4x16xbf16>, vector<4x16xf32> -> vector<4x16xf32>
    %94 = tpu.concatenate %72, %93 in 1 : vector<4x16xf32>, vector<4x16xf32> -> vector<4x32xf32>
    %95 = arith.truncf %94 : vector<4x32xf32> to vector<4x32xbf16>
    %c0_31 = arith.constant 0 : index
    %c0_32 = arith.constant 0 : index
    %c0_33 = arith.constant 0 : index
    %96 = vector.load %arg7[%c0_31, %c0_32, %c0_33] : memref<2x32x32xbf16, #tpu.memory_space<vmem>>, vector<1x32x32xbf16>
    %97 = vector.shape_cast %96 : vector<1x32x32xbf16> to vector<32x32xbf16>
    %cst_34 = arith.constant dense<0.000000e+00> : vector<4x32xf32>
    %98 = tpu.matmul %95, %97, %cst_34 {dimension_numbers = #tpu.dot_dimension_numbers<[1], [0], [0], [1], [0, 0, 1, 1], [], []>} : vector<4x32xbf16>, vector<32x32xbf16>, vector<4x32xf32> -> vector<4x32xf32>
    %99 = arith.addf %12, %98 : vector<4x32xf32>
    %100 = vector.broadcast %17 : vector<1x32xf32> to vector<4x32xf32>
    %101 = arith.addf %99, %100 : vector<4x32xf32>
    %cst_35 = arith.constant dense<0.000000e+00> : vector<4xf32>
    %102 = vector.multi_reduction <add>, %101, %cst_35 [1] : vector<4x32xf32> to vector<4xf32>
    %103 = vector.shape_cast %102 : vector<4xf32> to vector<4x1xf32>
    %cst_36 = arith.constant 3.200000e+01 : f32
    %104 = vector.broadcast %cst_36 : f32 to vector<4x1xf32>
    %105 = arith.divf %103, %104 : vector<4x1xf32>
    %106 = vector.broadcast %105 : vector<4x1xf32> to vector<4x32xf32>
    %107 = arith.subf %101, %106 : vector<4x32xf32>
    %108 = arith.mulf %107, %107 : vector<4x32xf32>
    %cst_37 = arith.constant dense<0.000000e+00> : vector<4xf32>
    %109 = vector.multi_reduction <add>, %108, %cst_37 [1] : vector<4x32xf32> to vector<4xf32>
    %110 = vector.shape_cast %109 : vector<4xf32> to vector<4x1xf32>
    %cst_38 = arith.constant 3.200000e+01 : f32
    %111 = vector.broadcast %cst_38 : f32 to vector<4x1xf32>
    %112 = arith.divf %110, %111 : vector<4x1xf32>
    %113 = vector.broadcast %105 : vector<4x1xf32> to vector<4x32xf32>
    %114 = arith.subf %101, %113 : vector<4x32xf32>
    %cst_39 = arith.constant 9.99999997E-7 : f32
    %115 = vector.broadcast %cst_39 : f32 to vector<4x1xf32>
    %116 = arith.addf %112, %115 : vector<4x1xf32>
    %117 = math.rsqrt %116 : vector<4x1xf32>
    %118 = vector.broadcast %117 : vector<4x1xf32> to vector<4x32xf32>
    %119 = arith.mulf %114, %118 : vector<4x32xf32>
    %120 = vector.broadcast %18 : vector<1x32xf32> to vector<4x32xf32>
    %121 = arith.mulf %119, %120 : vector<4x32xf32>
    %122 = vector.broadcast %19 : vector<1x32xf32> to vector<4x32xf32>
    %123 = arith.addf %121, %122 : vector<4x32xf32>
    %124 = arith.truncf %123 : vector<4x32xf32> to vector<4x32xbf16>
    %c0_40 = arith.constant 0 : index
    %c0_41 = arith.constant 0 : index
    %c0_42 = arith.constant 0 : index
    %125 = vector.load %arg9[%c0_40, %c0_41, %c0_42] : memref<2x32x64xbf16, #tpu.memory_space<vmem>>, vector<1x32x64xbf16>
    %126 = vector.shape_cast %125 : vector<1x32x64xbf16> to vector<32x64xbf16>
    %cst_43 = arith.constant dense<0.000000e+00> : vector<4x64xf32>
    %127 = tpu.matmul %124, %126, %cst_43 {dimension_numbers = #tpu.dot_dimension_numbers<[1], [0], [0], [1], [0, 0, 1, 1], [], []>} : vector<4x32xbf16>, vector<32x64xbf16>, vector<4x64xf32> -> vector<4x64xf32>
    %c0_44 = arith.constant 0 : index
    %c0_45 = arith.constant 0 : index
    %128 = vector.load %arg10[%c0_44, %c0_45] : memref<2x64xf32, #tpu.memory_space<vmem>>, vector<1x64xf32>
    %129 = vector.shape_cast %128 : vector<1x64xf32> to vector<64xf32>
    %130 = vector.shape_cast %129 : vector<64xf32> to vector<1x64xf32>
    %131 = vector.broadcast %130 : vector<1x64xf32> to vector<4x64xf32>
    %132 = arith.addf %127, %131 : vector<4x64xf32>
    %133 = arith.mulf %132, %132 : vector<4x64xf32>
    %134 = arith.mulf %132, %133 : vector<4x64xf32>
    %cst_46 = arith.constant 4.471500e-02 : f32
    %135 = vector.broadcast %cst_46 : f32 to vector<4x64xf32>
    %136 = arith.mulf %135, %134 : vector<4x64xf32>
    %137 = arith.addf %132, %136 : vector<4x64xf32>
    %cst_47 = arith.constant 0.797884583 : f32
    %138 = vector.broadcast %cst_47 : f32 to vector<4x64xf32>
    %139 = arith.mulf %138, %137 : vector<4x64xf32>
    %140 = math.tanh %139 : vector<4x64xf32>
    %cst_48 = arith.constant 1.000000e+00 : f32
    %141 = vector.broadcast %cst_48 : f32 to vector<4x64xf32>
    %142 = arith.addf %141, %140 : vector<4x64xf32>
    %cst_49 = arith.constant 5.000000e-01 : f32
    %143 = vector.broadcast %cst_49 : f32 to vector<4x64xf32>
    %144 = arith.mulf %143, %142 : vector<4x64xf32>
    %145 = arith.mulf %132, %144 : vector<4x64xf32>
    %146 = arith.truncf %145 : vector<4x64xf32> to vector<4x64xbf16>
    %c0_50 = arith.constant 0 : index
    %c0_51 = arith.constant 0 : index
    %c0_52 = arith.constant 0 : index
    %147 = vector.load %arg11[%c0_50, %c0_51, %c0_52] : memref<2x64x32xbf16, #tpu.memory_space<vmem>>, vector<1x64x32xbf16>
    %148 = vector.shape_cast %147 : vector<1x64x32xbf16> to vector<64x32xbf16>
    %cst_53 = arith.constant dense<0.000000e+00> : vector<4x32xf32>
    %149 = tpu.matmul %146, %148, %cst_53 {dimension_numbers = #tpu.dot_dimension_numbers<[1], [0], [0], [1], [0, 0, 1, 1], [], []>} : vector<4x64xbf16>, vector<64x32xbf16>, vector<4x32xf32> -> vector<4x32xf32>
    %150 = vector.broadcast %20 : vector<1x32xf32> to vector<4x32xf32>
    %151 = arith.addf %149, %150 : vector<4x32xf32>
    %152 = arith.addf %101, %151 : vector<4x32xf32>
    %c1_54 = arith.constant 1 : index
    %c0_55 = arith.constant 0 : index
    %c0_56 = arith.constant 0 : index
    %153 = vector.load %arg8[%c1_54, %c0_55, %c0_56] : memref<3x6x32xf32, #tpu.memory_space<vmem>>, vector<1x6x32xf32>
    %154 = vector.shape_cast %153 : vector<1x6x32xf32> to vector<6x32xf32>
    %155 = vector.extract_strided_slice %154 {offsets = [0, 0], sizes = [1, 32], strides = [1, 1]} : vector<6x32xf32> to vector<1x32xf32>
    %156 = vector.extract_strided_slice %154 {offsets = [1, 0], sizes = [1, 32], strides = [1, 1]} : vector<6x32xf32> to vector<1x32xf32>
    %157 = vector.extract_strided_slice %154 {offsets = [2, 0], sizes = [1, 32], strides = [1, 1]} : vector<6x32xf32> to vector<1x32xf32>
    %158 = vector.extract_strided_slice %154 {offsets = [3, 0], sizes = [1, 32], strides = [1, 1]} : vector<6x32xf32> to vector<1x32xf32>
    %159 = vector.extract_strided_slice %154 {offsets = [4, 0], sizes = [1, 32], strides = [1, 1]} : vector<6x32xf32> to vector<1x32xf32>
    %160 = vector.extract_strided_slice %154 {offsets = [5, 0], sizes = [1, 32], strides = [1, 1]} : vector<6x32xf32> to vector<1x32xf32>
    %cst_57 = arith.constant dense<0.000000e+00> : vector<4xf32>
    %161 = vector.multi_reduction <add>, %152, %cst_57 [1] : vector<4x32xf32> to vector<4xf32>
    %162 = vector.shape_cast %161 : vector<4xf32> to vector<4x1xf32>
    %cst_58 = arith.constant 3.200000e+01 : f32
    %163 = vector.broadcast %cst_58 : f32 to vector<4x1xf32>
    %164 = arith.divf %162, %163 : vector<4x1xf32>
    %165 = vector.broadcast %164 : vector<4x1xf32> to vector<4x32xf32>
    %166 = arith.subf %152, %165 : vector<4x32xf32>
    %167 = arith.mulf %166, %166 : vector<4x32xf32>
    %cst_59 = arith.constant dense<0.000000e+00> : vector<4xf32>
    %168 = vector.multi_reduction <add>, %167, %cst_59 [1] : vector<4x32xf32> to vector<4xf32>
    %169 = vector.shape_cast %168 : vector<4xf32> to vector<4x1xf32>
    %cst_60 = arith.constant 3.200000e+01 : f32
    %170 = vector.broadcast %cst_60 : f32 to vector<4x1xf32>
    %171 = arith.divf %169, %170 : vector<4x1xf32>
    %172 = vector.broadcast %164 : vector<4x1xf32> to vector<4x32xf32>
    %173 = arith.subf %152, %172 : vector<4x32xf32>
    %cst_61 = arith.constant 9.99999997E-7 : f32
    %174 = vector.broadcast %cst_61 : f32 to vector<4x1xf32>
    %175 = arith.addf %171, %174 : vector<4x1xf32>
    %176 = math.rsqrt %175 : vector<4x1xf32>
    %177 = vector.broadcast %176 : vector<4x1xf32> to vector<4x32xf32>
    %178 = arith.mulf %173, %177 : vector<4x32xf32>
    %179 = vector.broadcast %155 : vector<1x32xf32> to vector<4x32xf32>
    %180 = arith.mulf %178, %179 : vector<4x32xf32>
    %181 = vector.broadcast %156 : vector<1x32xf32> to vector<4x32xf32>
    %182 = arith.addf %180, %181 : vector<4x32xf32>
    %183 = arith.truncf %182 : vector<4x32xf32> to vector<4x32xbf16>
    %c1_62 = arith.constant 1 : index
    %c0_63 = arith.constant 0 : index
    %c0_64 = arith.constant 0 : index
    %184 = vector.load %arg5[%c1_62, %c0_63, %c0_64] : memref<2x32x96xbf16, #tpu.memory_space<vmem>>, vector<1x32x96xbf16>
    %185 = vector.shape_cast %184 : vector<1x32x96xbf16> to vector<32x96xbf16>
    %cst_65 = arith.constant dense<0.000000e+00> : vector<4x96xf32>
    %186 = tpu.matmul %183, %185, %cst_65 {dimension_numbers = #tpu.dot_dimension_numbers<[1], [0], [0], [1], [0, 0, 1, 1], [], []>} : vector<4x32xbf16>, vector<32x96xbf16>, vector<4x96xf32> -> vector<4x96xf32>
    %c1_66 = arith.constant 1 : index
    %c0_67 = arith.constant 0 : index
    %187 = vector.load %arg6[%c1_66, %c0_67] : memref<2x96xf32, #tpu.memory_space<vmem>>, vector<1x96xf32>
    %188 = vector.shape_cast %187 : vector<1x96xf32> to vector<96xf32>
    %189 = vector.shape_cast %188 : vector<96xf32> to vector<1x96xf32>
    %190 = vector.broadcast %189 : vector<1x96xf32> to vector<4x96xf32>
    %191 = arith.addf %186, %190 : vector<4x96xf32>
    %192 = vector.extract_strided_slice %191 {offsets = [0, 0], sizes = [4, 16], strides = [1, 1]} : vector<4x96xf32> to vector<4x16xf32>
    %193 = vector.extract_strided_slice %191 {offsets = [0, 32], sizes = [4, 16], strides = [1, 1]} : vector<4x96xf32> to vector<4x16xf32>
    %194 = vector.extract_strided_slice %191 {offsets = [0, 64], sizes = [4, 16], strides = [1, 1]} : vector<4x96xf32> to vector<4x16xf32>
    %195 = arith.truncf %192 : vector<4x16xf32> to vector<4x16xbf16>
    %196 = arith.truncf %193 : vector<4x16xf32> to vector<4x16xbf16>
    %cst_68 = arith.constant dense<0.000000e+00> : vector<4x4xf32>
    %197 = tpu.matmul %195, %196, %cst_68 {dimension_numbers = #tpu.dot_dimension_numbers<[1], [1], [0], [0], [0, 0, 1, 0], [], []>} : vector<4x16xbf16>, vector<4x16xbf16>, vector<4x4xf32> -> vector<4x4xf32>
    %cst_69 = arith.constant 2.500000e-01 : f32
    %198 = vector.broadcast %cst_69 : f32 to vector<4x4xf32>
    %199 = arith.mulf %197, %198 : vector<4x4xf32>
    %cst_70 = arith.constant dense<0xFF800000> : vector<4xf32>
    %200 = vector.multi_reduction <maximumf>, %199, %cst_70 [1] : vector<4x4xf32> to vector<4xf32>
    %201 = vector.shape_cast %200 : vector<4xf32> to vector<4x1xf32>
    %202 = vector.broadcast %201 : vector<4x1xf32> to vector<4x4xf32>
    %203 = arith.subf %199, %202 : vector<4x4xf32>
    %204 = math.exp %203 : vector<4x4xf32>
    %cst_71 = arith.constant dense<0.000000e+00> : vector<4xf32>
    %205 = vector.multi_reduction <add>, %204, %cst_71 [1] : vector<4x4xf32> to vector<4xf32>
    %206 = vector.shape_cast %205 : vector<4xf32> to vector<4x1xf32>
    %207 = tpu.reciprocal %206 {approx = true} : vector<4x1xf32> -> vector<4x1xf32>
    %208 = vector.broadcast %207 : vector<4x1xf32> to vector<4x4xf32>
    %209 = arith.mulf %204, %208 : vector<4x4xf32>
    %210 = arith.truncf %209 : vector<4x4xf32> to vector<4x4xbf16>
    %211 = arith.truncf %194 : vector<4x16xf32> to vector<4x16xbf16>
    %cst_72 = arith.constant dense<0.000000e+00> : vector<4x16xf32>
    %212 = tpu.matmul %210, %211, %cst_72 {dimension_numbers = #tpu.dot_dimension_numbers<[1], [0], [0], [1], [0, 0, 1, 1], [], []>} : vector<4x4xbf16>, vector<4x16xbf16>, vector<4x16xf32> -> vector<4x16xf32>
    %213 = vector.extract_strided_slice %191 {offsets = [0, 16], sizes = [4, 16], strides = [1, 1]} : vector<4x96xf32> to vector<4x16xf32>
    %214 = vector.extract_strided_slice %191 {offsets = [0, 48], sizes = [4, 16], strides = [1, 1]} : vector<4x96xf32> to vector<4x16xf32>
    %215 = vector.extract_strided_slice %191 {offsets = [0, 80], sizes = [4, 16], strides = [1, 1]} : vector<4x96xf32> to vector<4x16xf32>
    %216 = arith.truncf %213 : vector<4x16xf32> to vector<4x16xbf16>
    %217 = arith.truncf %214 : vector<4x16xf32> to vector<4x16xbf16>
    %cst_73 = arith.constant dense<0.000000e+00> : vector<4x4xf32>
    %218 = tpu.matmul %216, %217, %cst_73 {dimension_numbers = #tpu.dot_dimension_numbers<[1], [1], [0], [0], [0, 0, 1, 0], [], []>} : vector<4x16xbf16>, vector<4x16xbf16>, vector<4x4xf32> -> vector<4x4xf32>
    %cst_74 = arith.constant 2.500000e-01 : f32
    %219 = vector.broadcast %cst_74 : f32 to vector<4x4xf32>
    %220 = arith.mulf %218, %219 : vector<4x4xf32>
    %cst_75 = arith.constant dense<0xFF800000> : vector<4xf32>
    %221 = vector.multi_reduction <maximumf>, %220, %cst_75 [1] : vector<4x4xf32> to vector<4xf32>
    %222 = vector.shape_cast %221 : vector<4xf32> to vector<4x1xf32>
    %223 = vector.broadcast %222 : vector<4x1xf32> to vector<4x4xf32>
    %224 = arith.subf %220, %223 : vector<4x4xf32>
    %225 = math.exp %224 : vector<4x4xf32>
    %cst_76 = arith.constant dense<0.000000e+00> : vector<4xf32>
    %226 = vector.multi_reduction <add>, %225, %cst_76 [1] : vector<4x4xf32> to vector<4xf32>
    %227 = vector.shape_cast %226 : vector<4xf32> to vector<4x1xf32>
    %228 = tpu.reciprocal %227 {approx = true} : vector<4x1xf32> -> vector<4x1xf32>
    %229 = vector.broadcast %228 : vector<4x1xf32> to vector<4x4xf32>
    %230 = arith.mulf %225, %229 : vector<4x4xf32>
    %231 = arith.truncf %230 : vector<4x4xf32> to vector<4x4xbf16>
    %232 = arith.truncf %215 : vector<4x16xf32> to vector<4x16xbf16>
    %cst_77 = arith.constant dense<0.000000e+00> : vector<4x16xf32>
    %233 = tpu.matmul %231, %232, %cst_77 {dimension_numbers = #tpu.dot_dimension_numbers<[1], [0], [0], [1], [0, 0, 1, 1], [], []>} : vector<4x4xbf16>, vector<4x16xbf16>, vector<4x16xf32> -> vector<4x16xf32>
    %234 = tpu.concatenate %212, %233 in 1 : vector<4x16xf32>, vector<4x16xf32> -> vector<4x32xf32>
    %235 = arith.truncf %234 : vector<4x32xf32> to vector<4x32xbf16>
    %c1_78 = arith.constant 1 : index
    %c0_79 = arith.constant 0 : index
    %c0_80 = arith.constant 0 : index
    %236 = vector.load %arg7[%c1_78, %c0_79, %c0_80] : memref<2x32x32xbf16, #tpu.memory_space<vmem>>, vector<1x32x32xbf16>
    %237 = vector.shape_cast %236 : vector<1x32x32xbf16> to vector<32x32xbf16>
    %cst_81 = arith.constant dense<0.000000e+00> : vector<4x32xf32>
    %238 = tpu.matmul %235, %237, %cst_81 {dimension_numbers = #tpu.dot_dimension_numbers<[1], [0], [0], [1], [0, 0, 1, 1], [], []>} : vector<4x32xbf16>, vector<32x32xbf16>, vector<4x32xf32> -> vector<4x32xf32>
    %239 = arith.addf %152, %238 : vector<4x32xf32>
    %240 = vector.broadcast %157 : vector<1x32xf32> to vector<4x32xf32>
    %241 = arith.addf %239, %240 : vector<4x32xf32>
    %cst_82 = arith.constant dense<0.000000e+00> : vector<4xf32>
    %242 = vector.multi_reduction <add>, %241, %cst_82 [1] : vector<4x32xf32> to vector<4xf32>
    %243 = vector.shape_cast %242 : vector<4xf32> to vector<4x1xf32>
    %cst_83 = arith.constant 3.200000e+01 : f32
    %244 = vector.broadcast %cst_83 : f32 to vector<4x1xf32>
    %245 = arith.divf %243, %244 : vector<4x1xf32>
    %246 = vector.broadcast %245 : vector<4x1xf32> to vector<4x32xf32>
    %247 = arith.subf %241, %246 : vector<4x32xf32>
    %248 = arith.mulf %247, %247 : vector<4x32xf32>
    %cst_84 = arith.constant dense<0.000000e+00> : vector<4xf32>
    %249 = vector.multi_reduction <add>, %248, %cst_84 [1] : vector<4x32xf32> to vector<4xf32>
    %250 = vector.shape_cast %249 : vector<4xf32> to vector<4x1xf32>
    %cst_85 = arith.constant 3.200000e+01 : f32
    %251 = vector.broadcast %cst_85 : f32 to vector<4x1xf32>
    %252 = arith.divf %250, %251 : vector<4x1xf32>
    %253 = vector.broadcast %245 : vector<4x1xf32> to vector<4x32xf32>
    %254 = arith.subf %241, %253 : vector<4x32xf32>
    %cst_86 = arith.constant 9.99999997E-7 : f32
    %255 = vector.broadcast %cst_86 : f32 to vector<4x1xf32>
    %256 = arith.addf %252, %255 : vector<4x1xf32>
    %257 = math.rsqrt %256 : vector<4x1xf32>
    %258 = vector.broadcast %257 : vector<4x1xf32> to vector<4x32xf32>
    %259 = arith.mulf %254, %258 : vector<4x32xf32>
    %260 = vector.broadcast %158 : vector<1x32xf32> to vector<4x32xf32>
    %261 = arith.mulf %259, %260 : vector<4x32xf32>
    %262 = vector.broadcast %159 : vector<1x32xf32> to vector<4x32xf32>
    %263 = arith.addf %261, %262 : vector<4x32xf32>
    %264 = arith.truncf %263 : vector<4x32xf32> to vector<4x32xbf16>
    %c1_87 = arith.constant 1 : index
    %c0_88 = arith.constant 0 : index
    %c0_89 = arith.constant 0 : index
    %265 = vector.load %arg9[%c1_87, %c0_88, %c0_89] : memref<2x32x64xbf16, #tpu.memory_space<vmem>>, vector<1x32x64xbf16>
    %266 = vector.shape_cast %265 : vector<1x32x64xbf16> to vector<32x64xbf16>
    %cst_90 = arith.constant dense<0.000000e+00> : vector<4x64xf32>
    %267 = tpu.matmul %264, %266, %cst_90 {dimension_numbers = #tpu.dot_dimension_numbers<[1], [0], [0], [1], [0, 0, 1, 1], [], []>} : vector<4x32xbf16>, vector<32x64xbf16>, vector<4x64xf32> -> vector<4x64xf32>
    %c1_91 = arith.constant 1 : index
    %c0_92 = arith.constant 0 : index
    %268 = vector.load %arg10[%c1_91, %c0_92] : memref<2x64xf32, #tpu.memory_space<vmem>>, vector<1x64xf32>
    %269 = vector.shape_cast %268 : vector<1x64xf32> to vector<64xf32>
    %270 = vector.shape_cast %269 : vector<64xf32> to vector<1x64xf32>
    %271 = vector.broadcast %270 : vector<1x64xf32> to vector<4x64xf32>
    %272 = arith.addf %267, %271 : vector<4x64xf32>
    %273 = arith.mulf %272, %272 : vector<4x64xf32>
    %274 = arith.mulf %272, %273 : vector<4x64xf32>
    %cst_93 = arith.constant 4.471500e-02 : f32
    %275 = vector.broadcast %cst_93 : f32 to vector<4x64xf32>
    %276 = arith.mulf %275, %274 : vector<4x64xf32>
    %277 = arith.addf %272, %276 : vector<4x64xf32>
    %cst_94 = arith.constant 0.797884583 : f32
    %278 = vector.broadcast %cst_94 : f32 to vector<4x64xf32>
    %279 = arith.mulf %278, %277 : vector<4x64xf32>
    %280 = math.tanh %279 : vector<4x64xf32>
    %cst_95 = arith.constant 1.000000e+00 : f32
    %281 = vector.broadcast %cst_95 : f32 to vector<4x64xf32>
    %282 = arith.addf %281, %280 : vector<4x64xf32>
    %cst_96 = arith.constant 5.000000e-01 : f32
    %283 = vector.broadcast %cst_96 : f32 to vector<4x64xf32>
    %284 = arith.mulf %283, %282 : vector<4x64xf32>
    %285 = arith.mulf %272, %284 : vector<4x64xf32>
    %286 = arith.truncf %285 : vector<4x64xf32> to vector<4x64xbf16>
    %c1_97 = arith.constant 1 : index
    %c0_98 = arith.constant 0 : index
    %c0_99 = arith.constant 0 : index
    %287 = vector.load %arg11[%c1_97, %c0_98, %c0_99] : memref<2x64x32xbf16, #tpu.memory_space<vmem>>, vector<1x64x32xbf16>
    %288 = vector.shape_cast %287 : vector<1x64x32xbf16> to vector<64x32xbf16>
    %cst_100 = arith.constant dense<0.000000e+00> : vector<4x32xf32>
    %289 = tpu.matmul %286, %288, %cst_100 {dimension_numbers = #tpu.dot_dimension_numbers<[1], [0], [0], [1], [0, 0, 1, 1], [], []>} : vector<4x64xbf16>, vector<64x32xbf16>, vector<4x32xf32> -> vector<4x32xf32>
    %290 = vector.broadcast %160 : vector<1x32xf32> to vector<4x32xf32>
    %291 = arith.addf %289, %290 : vector<4x32xf32>
    %292 = arith.addf %241, %291 : vector<4x32xf32>
    %c2 = arith.constant 2 : index
    %c0_101 = arith.constant 0 : index
    %c0_102 = arith.constant 0 : index
    %293 = vector.load %arg8[%c2, %c0_101, %c0_102] : memref<3x6x32xf32, #tpu.memory_space<vmem>>, vector<1x6x32xf32>
    %294 = vector.shape_cast %293 : vector<1x6x32xf32> to vector<6x32xf32>
    %295 = vector.extract_strided_slice %294 {offsets = [0, 0], sizes = [1, 32], strides = [1, 1]} : vector<6x32xf32> to vector<1x32xf32>
    %296 = vector.extract_strided_slice %294 {offsets = [1, 0], sizes = [1, 32], strides = [1, 1]} : vector<6x32xf32> to vector<1x32xf32>
    %cst_103 = arith.constant dense<0.000000e+00> : vector<4xf32>
    %297 = vector.multi_reduction <add>, %292, %cst_103 [1] : vector<4x32xf32> to vector<4xf32>
    %298 = vector.shape_cast %297 : vector<4xf32> to vector<4x1xf32>
    %cst_104 = arith.constant 3.200000e+01 : f32
    %299 = vector.broadcast %cst_104 : f32 to vector<4x1xf32>
    %300 = arith.divf %298, %299 : vector<4x1xf32>
    %301 = vector.broadcast %300 : vector<4x1xf32> to vector<4x32xf32>
    %302 = arith.subf %292, %301 : vector<4x32xf32>
    %303 = arith.mulf %302, %302 : vector<4x32xf32>
    %cst_105 = arith.constant dense<0.000000e+00> : vector<4xf32>
    %304 = vector.multi_reduction <add>, %303, %cst_105 [1] : vector<4x32xf32> to vector<4xf32>
    %305 = vector.shape_cast %304 : vector<4xf32> to vector<4x1xf32>
    %cst_106 = arith.constant 3.200000e+01 : f32
    %306 = vector.broadcast %cst_106 : f32 to vector<4x1xf32>
    %307 = arith.divf %305, %306 : vector<4x1xf32>
    %308 = vector.broadcast %300 : vector<4x1xf32> to vector<4x32xf32>
    %309 = arith.subf %292, %308 : vector<4x32xf32>
    %cst_107 = arith.constant 9.99999997E-7 : f32
    %310 = vector.broadcast %cst_107 : f32 to vector<4x1xf32>
    %311 = arith.addf %307, %310 : vector<4x1xf32>
    %312 = math.rsqrt %311 : vector<4x1xf32>
    %313 = vector.broadcast %312 : vector<4x1xf32> to vector<4x32xf32>
    %314 = arith.mulf %309, %313 : vector<4x32xf32>
    %315 = vector.broadcast %295 : vector<1x32xf32> to vector<4x32xf32>
    %316 = arith.mulf %314, %315 : vector<4x32xf32>
    %317 = vector.broadcast %296 : vector<1x32xf32> to vector<4x32xf32>
    %318 = arith.addf %316, %317 : vector<4x32xf32>
    %319 = arith.truncf %318 : vector<4x32xf32> to vector<4x32xbf16>
    %c0_108 = arith.constant 0 : index
    %c0_109 = arith.constant 0 : index
    %320 = vector.load %arg12[%c0_108, %c0_109] : memref<32x16xbf16, #tpu.memory_space<vmem>>, vector<32x16xbf16>
    %cst_110 = arith.constant dense<0.000000e+00> : vector<4x16xf32>
    %321 = tpu.matmul %319, %320, %cst_110 {dimension_numbers = #tpu.dot_dimension_numbers<[1], [0], [0], [1], [0, 0, 1, 1], [], []>} : vector<4x32xbf16>, vector<32x16xbf16>, vector<4x16xf32> -> vector<4x16xf32>
    %322 = vector.extract_strided_slice %294 {offsets = [2, 0], sizes = [1, 16], strides = [1, 1]} : vector<6x32xf32> to vector<1x16xf32>
    %323 = vector.broadcast %322 : vector<1x16xf32> to vector<4x16xf32>
    %324 = arith.addf %321, %323 : vector<4x16xf32>
    %cst_111 = arith.constant 0.000000e+00 : f32
    %325 = vector.broadcast %cst_111 : f32 to vector<4x16xf32>
    %326 = arith.maximumf %324, %325 : vector<4x16xf32>
    %327 = vector.extract_strided_slice %294 {offsets = [3, 0], sizes = [1, 16], strides = [1, 1]} : vector<6x32xf32> to vector<1x16xf32>
    %cst_112 = arith.constant dense<0.000000e+00> : vector<1x4xf32>
    %328 = tpu.matmul %327, %326, %cst_112 {dimension_numbers = #tpu.dot_dimension_numbers<[1], [1], [0], [0], [0, 0, 1, 0], [], []>} : vector<1x16xf32>, vector<4x16xf32>, vector<1x4xf32> -> vector<1x4xf32>
    %329 = vector.extract_strided_slice %294 {offsets = [4, 0], sizes = [1, 1], strides = [1, 1]} : vector<6x32xf32> to vector<1x1xf32>
    %330 = vector.broadcast %329 : vector<1x1xf32> to vector<1x4xf32>
    %331 = arith.addf %328, %330 : vector<1x4xf32>
    %cst_113 = arith.constant 0.000000e+00 : f32
    %332 = vector.broadcast %cst_113 : f32 to vector<1x4xf32>
    %333 = arith.maximumf %331, %332 : vector<1x4xf32>
    %c0_114 = arith.constant 0 : index
    %c0_115 = arith.constant 0 : index
    %334 = vector.load %arg13[%c0_114, %c0_115] : memref<4x256xf32, #tpu.memory_space<vmem>>, vector<4x256xf32>
    %cst_116 = arith.constant dense<0.000000e+00> : vector<1x256xf32>
    %335 = tpu.matmul %333, %334, %cst_116 {dimension_numbers = #tpu.dot_dimension_numbers<[1], [0], [0], [1], [0, 0, 1, 1], [], []>} : vector<1x4xf32>, vector<4x256xf32>, vector<1x256xf32> -> vector<1x256xf32>
    %336 = vector.shape_cast %335 : vector<1x256xf32> to vector<1x1x256xf32>
    %c0_117 = arith.constant 0 : index
    %c0_118 = arith.constant 0 : index
    %c0_119 = arith.constant 0 : index
    %337 = vector.load %arg14[%c0_117, %c0_118, %c0_119] : memref<1x1x256xf32, #tpu.memory_space<vmem>>, vector<1x1x256xf32>
    tpu.vector_store %arg14[%c0_117, %c0_118, %c0_119], %336 {strides = array<i32>} : memref<1x1x256xf32, #tpu.memory_space<vmem>>, vector<1x1x256xf32>,
    return
  }
  func.func @transform_0(%arg0: i32) -> i32 {
    %c0_i32 = arith.constant 0 : i32
    %c0_i32_0 = arith.constant 0 : i32
    return %c0_i32 : i32
  }
  func.func @transform_1(%arg0: i32) -> (i32, i32, i32) {
    %c0_i32 = arith.constant 0 : i32
    %c0_i32_0 = arith.constant 0 : i32
    %c0_i32_1 = arith.constant 0 : i32
    return %arg0, %c0_i32, %c0_i32_0 : i32, i32, i32
  }
  func.func @transform_2(%arg0: i32) -> (i32, i32) {
    %c0_i32 = arith.constant 0 : i32
    %c0_i32_0 = arith.constant 0 : i32
    %c0_i32_1 = arith.constant 0 : i32
    return %c0_i32, %c0_i32_0 : i32, i32
  }
  func.func @transform_3(%arg0: i32) -> (i32, i32) {
    %c0_i32 = arith.constant 0 : i32
    %c0_i32_0 = arith.constant 0 : i32
    %c0_i32_1 = arith.constant 0 : i32
    return %c0_i32, %c0_i32_0 : i32, i32
  }
  func.func @transform_4(%arg0: i32) -> (i32, i32, i32) {
    %c0_i32 = arith.constant 0 : i32
    %c0_i32_0 = arith.constant 0 : i32
    %c0_i32_1 = arith.constant 0 : i32
    %c0_i32_2 = arith.constant 0 : i32
    return %c0_i32, %c0_i32_0, %c0_i32_1 : i32, i32, i32
  }
  func.func @transform_5(%arg0: i32) -> (i32, i32) {
    %c0_i32 = arith.constant 0 : i32
    %c0_i32_0 = arith.constant 0 : i32
    %c0_i32_1 = arith.constant 0 : i32
    return %c0_i32, %c0_i32_0 : i32, i32
  }
  func.func @transform_6(%arg0: i32) -> (i32, i32, i32) {
    %c0_i32 = arith.constant 0 : i32
    %c0_i32_0 = arith.constant 0 : i32
    %c0_i32_1 = arith.constant 0 : i32
    %c0_i32_2 = arith.constant 0 : i32
    return %c0_i32, %c0_i32_0, %c0_i32_1 : i32, i32, i32
  }
  func.func @transform_7(%arg0: i32) -> (i32, i32, i32) {
    %c0_i32 = arith.constant 0 : i32
    %c0_i32_0 = arith.constant 0 : i32
    %c0_i32_1 = arith.constant 0 : i32
    %c0_i32_2 = arith.constant 0 : i32
    return %c0_i32, %c0_i32_0, %c0_i32_1 : i32, i32, i32
  }
  func.func @transform_8(%arg0: i32) -> (i32, i32, i32) {
    %c0_i32 = arith.constant 0 : i32
    %c0_i32_0 = arith.constant 0 : i32
    %c0_i32_1 = arith.constant 0 : i32
    %c0_i32_2 = arith.constant 0 : i32
    return %c0_i32, %c0_i32_0, %c0_i32_1 : i32, i32, i32
  }
  func.func @transform_9(%arg0: i32) -> (i32, i32) {
    %c0_i32 = arith.constant 0 : i32
    %c0_i32_0 = arith.constant 0 : i32
    %c0_i32_1 = arith.constant 0 : i32
    return %c0_i32, %c0_i32_0 : i32, i32
  }
  func.func @transform_10(%arg0: i32) -> (i32, i32, i32) {
    %c0_i32 = arith.constant 0 : i32
    %c0_i32_0 = arith.constant 0 : i32
    %c0_i32_1 = arith.constant 0 : i32
    %c0_i32_2 = arith.constant 0 : i32
    return %c0_i32, %c0_i32_0, %c0_i32_1 : i32, i32, i32
  }
  func.func @transform_11(%arg0: i32) -> (i32, i32) {
    %c0_i32 = arith.constant 0 : i32
    %c0_i32_0 = arith.constant 0 : i32
    %c0_i32_1 = arith.constant 0 : i32
    return %c0_i32, %c0_i32_0 : i32, i32
  }
  func.func @transform_12(%arg0: i32) -> (i32, i32) {
    %c0_i32 = arith.constant 0 : i32
    %c0_i32_0 = arith.constant 0 : i32
    %c0_i32_1 = arith.constant 0 : i32
    return %c0_i32, %c0_i32_0 : i32, i32
  }
  func.func @transform_13(%arg0: i32) -> (i32, i32, i32) {
    %c0_i32 = arith.constant 0 : i32
    %c0_i32_0 = arith.constant 0 : i32
    %c0_i32_1 = arith.constant 0 : i32
    return %arg0, %c0_i32, %c0_i32_0 : i32, i32, i32
  }
}

</mosaic_0001>

<bundles_post_ra>
// kernel: depth_forward.1
= control target key start
LH: loop header
LB: loop body
LE: loop exit
PB: predicated region body
PF: predicated region fallthrough
CT: control target
= control target key end

     0   :  { %18 = vsyncpa [#allocation3], 0  ;;  %s1915_s25 = smov 0   ;;  %s2168_s0 = inlined_call_operand.vmem [shape: f32[2], index: 0, kind: input, shape index: {}]   ;;  %s2169_s1 = inlined_call_operand.vmem [shape: f32[2,4,192], index: 1, kind: input, shape index: {}]   ;;  %s2170_s2 = inlined_call_operand.vmem [shape: bf16[192,32], index: 2, kind: input, shape index: {}]   ;;  %s2171_s3 = inlined_call_operand.vmem [shape: f32[4,32], index: 3, kind: input, shape index: {}]   ;;  %s2172_s4 = inlined_call_operand.vmem [shape: bf16[2,32,96], index: 4, kind: input, shape index: {}]   ;;  %s2173_s5 = inlined_call_operand.vmem [shape: f32[2,96], index: 5, kind: input, shape index: {}]   ;;  %s2174_s6 = inlined_call_operand.vmem [shape: bf16[2,32,32], index: 6, kind: input, shape index: {}]   ;;  %s2175_s7 = inlined_call_operand.vmem [shape: f32[3,6,32], index: 7, kind: input, shape index: {}]   ;;  %s2176_s8 = inlined_call_operand.vmem [shape: bf16[2,32,64], index: 8, kind: input, shape index: {}]   ;;  %s2177_s9 = inlined_call_operand.vmem [shape: f32[2,64], index: 9, kind: input, shape index: {}]   ;;  %s2178_s10 = inlined_call_operand.vmem [shape: bf16[2,64,32], index: 10, kind: input, shape index: {}]   ;;  %s2179_s11 = inlined_call_operand.vmem [shape: bf16[32,16], index: 11, kind: input, shape index: {}]   ;;  %s2180_s12 = inlined_call_operand.vmem [shape: f32[4,256], index: 12, kind: input, shape index: {}]   ;;  %s2181_s13 = inlined_call_operand.vmem [shape: f32[2,1,256], index: 13, kind: output, shape index: {}]  }
   0x1 LB: > { %s1515_s26 = sadd.s32 4294967295, %s1834_s25   ;;  %p1517_p0 = scmp.ge.s32.totalorder %s1834_s25, 1  ;;  %s1834_s25 = sphi %s1915_s25, %s24_s25  }
   0x2   : > { %p333_p1 = scmp.lt.s32.totalorder %s1834_s25, 3  ;;  %s345_s29 = sshll.u32 %s2168_s0, 4  ;;  %s346_s29 = int_to_ptr.vmem [resolvable:$true] %s345_s29 }
   0x3   : > { %p1753_p3 = scmp.eq.s32.totalorder %s1515_s26, 0  ;;  %s1836_s30 = smov [#allocation2]  }
   0x4   : > { %p334_p2 = pnand %p1517_p0, %p333_p1 }
   0x6   : > { %p1749_p4 = pneg %p334_p2  ;;  %399 = sbr.rel (%p334_p2) target bundleno = 4569 (0x11d9), region = 72 }
   0x8   : > { %p1750_p5 = pnand %p1753_p3, %p1749_p4 }
   0xa   : > { %1752 = dma.vmem_to_smem (!%p1750_p5), %s346_s29, 16, %s1836_s30, [#allocation3]  }
   0xb   : > { %1829 = dma.done.wait (%p1753_p3), [#allocation3], 16  }
   0xc   : > { %1831 = vsyncadd (%p1753_p3), [#allocation3], 4294967280 }
   0xd   : > { %406 = sfence }
   0xe   : > { %v1718_v0 = vld [vmem:[%s2170_s2 + $0x38] sm:$0xff]  ;;  %p444_p6 = scmp.lt.s32.totalorder %s1515_s26, 1  ;;  %s454_s16 = sld [smem:[#allocation2]]  ;;  %v1717_v2 = vld [vmem:[%s2170_s2 + $0x30] sm:$0xff]  ;;  %v1716_v4 = vld [vmem:[%s2170_s2 + $0x28] sm:$0xff]  ;;  %vm566_vm0 = vcmask 523264  }
   0xf   : > { %v1722_v1 = vld [vmem:[%s2170_s2 + $0x58] sm:$0xff]  ;;  %s1525_s19 = sld [smem:[#allocation2 + $0x1]]  ;;  %570 = vmatpush.bf16.msra.mxu0 %v1718_v0  ;;  %v1721_v3 = vld [vmem:[%s2170_s2 + $0x50] sm:$0xff]  ;;  %v1720_v7 = vld [vmem:[%s2170_s2 + $0x48] sm:$0xff]  ;;  %vm597_vm1 = vcmask 257024   ;;  %v1837_v30 = vmov 32.0  }
  0x10   : > { %s2185_s26 = smov (!%p444_p6, %s1515_s26), 1  ;;  %587 = vmatpush.bf16.msra.mxu1 %v1722_v1  ;;  %v1715_v11 = vld [vmem:[%s2170_s2 + $0x20] sm:$0xff]  ;;  %v1714_v13 = vld [vmem:[%s2170_s2 + $0x18] sm:$0xff]  ;;  %v1713_v15 = vld [vmem:[%s2170_s2 + $0x10] sm:$0xff]  ;;  %1777 = vrcp.f32 %v1837_v30  ;;  %vm650_vm6 = vcmask 261120   ;;  %s1838_s28 = smov 112  }
  0x11   : > { %s1710_s24 = sshll.u32 %s2185_s26, 3  ;;  %v1719_v12 = vld [vmem:[%s2170_s2 + $0x40] sm:$0xff]  ;;  %v1712_v19 = vld [vmem:[%s2170_s2 + $0x8] sm:$0xff]  ;;  %s1840_s30 = smov 80   ;;  %vm671_vm7 = vcmask 130048   ;;  %vm692_vm8 = vcmask 27648  }
  0x12   : > { %s448_s29 = scalar_lea.vmem %s2169_s1, %s1710_s24  ;;  %v1386_v14 = vld [vmem:[%s2180_s12] sm:$0xff]  ;;  %v1724_v42 = vld [vmem:[%s2172_s4 + $0x8] sm:$0xff]  ;;  %s1841_s14 = smov 48   ;;  %vm711_vm9 = vcmask 1041408   ;;  %vm707_vm10 = vcmask 31744  }
  0x13   : > { %571 = vmatpush.bf16.msra.mxu0 %v1717_v2  ;;  %v456_v5 = vld [vmem:[%s448_s29] sm:$0xff]  ;;  %660 = vmatpush.bf16.msra.mxu2 %v1724_v42  ;;  %s1839_s29 = smov 96   ;;  %s1842_s15 = smov 64  }
  0x14   : > { %v457_v6 = vstv %s454_s16  ;;  %588 = vmatpush.bf16.msra.mxu1 %v1721_v3  ;;  %v1711_v20 = vld [vmem:[%s2170_s2] sm:$0xff]  ;;  %s2182_s20 = smov 16   ;;  %s1524_s18 = sshll.u32 %s2185_s26, 1 }
  0x15   : > { %v458_v8 = vsub.f32 %v456_v5, %v457_v6  ;;  %v459_v9 = vstv %s1525_s19  ;;  %v493_v24 = vld [vmem:[%s2171_s3] sm:$0xf]  ;;  %s452_s16 = scalar_lea.vmem %s2181_s13, %s1524_s18 }
  0x16   : > { %v1778_v31 = vpop.eup %1777  ;;  %v1723_v43 = vld [vmem:[%s2172_s4] sm:$0xff] }
  0x17   : > { %v460_v10 = vmul.f32 %v459_v9, %v458_v8  ;;  %572 = vmatpush.bf16.msra.mxu0 %v1716_v4  ;;  %v602_v32 = vmul.f32 32.0, %v1778_v31  ;;  %vm606_vm2 = vweird.f32 %v1778_v31  ;;  %661 = vmatpush.bf16.msra.mxu2 %v1723_v43  ;;  %v1994_v52 = vld [vmem:[%s2175_s7] sm:$0x3f] }
  0x18   : > { %589 = vmatpush.bf16.msra.mxu1 %v1720_v7  ;;  %v627_v54 = vperm.slane %v1994_v52, 0  ;;  %v629_v57 = vperm.slane %v1994_v52, 1  ;;  %v1773_v61 = vld [vmem:[%s2173_s5] ss:$0 sm:$0xff] }
  0x19   : > { %462 = vst [vmem:[#allocation1] ss:$2 sm:$0xff] %v460_v10  ;;  %v603_v33 = vsub.f32 1.0, %v602_v32 }
  0x1b   : > { %573 = vmatpush.bf16.msra.mxu0 %v1715_v11  ;;  %v604_v34 = vmul.f32 %v1778_v31, %v603_v33 }
  0x1c   : > { %590 = vmatpush.bf16.msra.mxu1 %v1719_v12 }
  0x1d   : > { %v605_v35 = vadd.f32 %v1778_v31, %v604_v34 }
  0x1f   : > { %574 = vmatpush.bf16.msra.mxu0 %v1714_v13  ;;  %v1979_v36 = vsel %vm606_vm2, %v1778_v31, %v605_v35 }
  0x20   : > { %v464_v16 = vld.sshfl [vmem:[#allocation1 + $0x8] sm:$0xff pattern:$0x75316420]  ;;  %v463_v17 = vld.sshfl [vmem:[#allocation1] sm:$0xff pattern:$0x75316420] }
  0x21   : > { %v468_v18 = vpack.c.bf16 %v464_v16, %v464_v16  ;;  %1388 = vst [vmem:[#allocation1] ss:$2 sm:$0xff] %v1386_v14  ;;  %v467_v21 = vpack.c.bf16 %v463_v17, %v463_v17 }
  0x23   : > { %1574 = vmatmul.msk.bf16.vlgmr.msra.gmra.mxu1 %vm566_vm0, %v468_v18  ;;  %575 = vmatpush.bf16.msra.mxu0 %v1713_v15 }
  0x27   : > { %576 = vmatpush.bf16.msra.mxu0 %v1712_v19 }
  0x2b   : > { %577 = vmatpush.bf16.msra.mxu0 %v1711_v20 }
  0x2e   : > { %578 = vmatmul.bf16.vlgmr.msra.gmra.mxu0 %v467_v21 }
  0xa0   : > { %v592_v22 = vpop.f32.mrf.mxu1 }
  0xa8   : > { %v594_v23 = vpop.f32.mrf.mxu1 }
  0xab   : > { %v579_v25 = vpop.f32.mrf.mxu0 }
  0xac   : > { %v580_v26 = vadd.f32 %v579_v25, %v493_v24 }
  0xae   : > { %v1975_v27 = vadd.f32 %v592_v22, %v580_v26 }
  0xb0   : > { %v598_v28 = vsel %vm597_vm1, %v1975_v27, 0.0 }
  0xb1   : > { %599 = vadd.xlane.f32.xlu0 %v598_v28 }
  0xb3   : > { %v581_v29 = vpop.f32.mrf.mxu0 }
 0x124   : > { %v600_v37 = vpop.xlane.xlu0 %599 }
 0x125   : > { %v608_v38 = vmul.f32 %v1979_v36, %v600_v37 }
 0x127   : > { %v609_v39 = vsub.f32 %v1975_v27, %v608_v38 }
 0x129   : > { %v610_v40 = vmul.f32 %v609_v39, %v609_v39 }
 0x12b   : > { %v611_v41 = vsel %vm597_vm1, %v610_v40, 0.0 }
 0x12c   : > { %612 = vadd.xlane.f32.xlu0 %v611_v41 }
 0x19f   : > { %v613_v44 = vpop.xlane.xlu0 %612 }
 0x1a0   : > { %v614_v45 = vmul.f32 %v613_v44, %v1979_v36  ;;  %v1725_v44 = vld [vmem:[%s2174_s6] sm:$0xff] }
 0x1a2   : > { %v615_v46 = vadd.f32 1e-06, %v614_v45 }
 0x1a4   : > { %1779 = vrsqrt.f32 %v615_v46  ;;  %vm622_vm4 = vweird.f32 %v615_v46 }
 0x1aa   : > { %v1780_v47 = vpop.eup %1779 }
 0x1ab   : > { %v617_v48 = vmul.f32 %v1780_v47, %v615_v46  ;;  %vm623_vm3 = vweird.f32 %v1780_v47 }
 0x1ac   : > { %vm624_vm5 = vmor %vm622_vm4, %vm623_vm3 }
 0x1ad   : > { %v618_v49 = vmul.f32 %v1780_v47, %v617_v48  ;;  %v824_v48 = vperm.slane %v1994_v52, 2 }
 0x1af   : > { %v619_v50 = vmul.f32 0.5, %v618_v49 }
 0x1b1   : > { %v620_v51 = vsub.f32 1.5, %v619_v50 }
 0x1b3   : > { %v621_v53 = vmul.f32 %v1780_v47, %v620_v51 }
 0x1b5   : > { %v625_v55 = vsel %vm624_vm5, %v1780_v47, %v621_v53 }
 0x1b6   : > { %v626_v56 = vmul.f32 %v625_v55, %v609_v39  ;;  %v1726_v39 = vld [vmem:[%s2174_s6 + $0x8] sm:$0xff] }
 0x1b8   : > { %v628_v58 = vmul.f32 %v627_v54, %v626_v56 }
 0x1ba   : > { %v630_v59 = vadd.f32 %v629_v57, %v628_v58 }
 0x1bc   : > { %v631_v60 = vpack.c.bf16 %v630_v59, %v630_v59 }
 0x1be   : > { %1583 = vmatmul.msk.bf16.vlgmr.msra.gmra.mxu2 %vm650_vm6, %v631_v60  ;;  %v1728_v60 = vld [vmem:[%s2176_s8 + $0x8] sm:$0xff] }
 0x241   : > { %v663_v62 = vpop.f32.mrf.mxu2 }
 0x242   : > { %v664_v63 = vadd.f32 %v1773_v61, %v663_v62 }
 0x244   : > { %v667_v0 = vpack.c.bf16 %v664_v63, %v664_v63 }
 0x246   : > { %728 = vrot.lane.b32.xlu2 %v667_v0, %s1838_s28  ;;  %669 = vrot.lane.b32.xlu1 %v667_v0, %s1839_s29 }
 0x249   : > { %v665_v1 = vpop.f32.mrf.mxu2 }
 0x24e   : > { %730 = vrot.lane.b32.xlu1 %v667_v0, %s1840_s30 }
 0x2a0   : > { %v729_v6 = vpop.permute.xlu2 %728 }
 0x2b8   : > { %v670_v2 = vpop.permute.xlu1 %669 }
 0x2b9   : > { %v676_v3 = vsel %vm671_vm7, %v670_v2, 0 }
 0x2ba   : > { %685 = vmatpush.bf16.xpose.msra.mxu3 %v676_v3 }
 0x2c0   : > { %v731_v4 = vpop.permute.xlu1 %730 }
 0x2c1   : > { %1584 = vmatmul.msk.bf16.vlgmr.msra.gmra.mxu3 %vm671_vm7, %v667_v0  ;;  %v736_v5 = vsel %vm671_vm7, %v731_v4, 0 }
 0x2c2   : > { %745 = vmatpush.bf16.xpose.msrb.mxu3 %v736_v5 }
 0x2ca   : > { %880 = vmatpush.bf16.msra.mxu3 %v1728_v60 }
 0x2d1   : > { %1586 = vmatmul.msk.bf16.vlgmr.msrb.gmra.mxu3 %vm671_vm7, %v729_v6  ;;  %v848_v6 = vperm.slane %v1994_v52, 3 }
 0x344   : > { %v687_v7 = vpop.f32.mrf.mxu3 }
 0x345   : > { %v691_v8 = vmul.f32 0.25, %v687_v7 }
 0x347   : > { %v693_v9 = vsel %vm692_vm8, %v691_v8, -inf }
 0x348   : > { %694 = vmax.xlane.f32.xlu0 %v693_v9  ;;  %v850_v9 = vperm.slane %v1994_v52, 4 }
 0x34c   : > { %v689_v10 = vpop.f32.mrf.mxu3 }
 0x354   : > { %v747_v11 = vpop.f32.mrf.mxu3 }
 0x355   : > { %v751_v12 = vmul.f32 0.25, %v747_v11 }
 0x357   : > { %v752_v13 = vsel %vm692_vm8, %v751_v12, -inf }
 0x358   : > { %753 = vmax.xlane.f32.xlu2 %v752_v13  ;;  %v1732_v13 = vld [vmem:[%s2178_s10 + $0x18] sm:$0xff] }
 0x359   : > { %937 = vmatpush.bf16.msrb.mxu0 %v1732_v13 }
 0x35c   : > { %764 = vrot.lane.b32.xlu0 %v667_v0, %s1841_s14  ;;  %v749_v14 = vpop.f32.mrf.mxu3 }
 0x35d   : > { %v1731_v14 = vld [vmem:[%s2178_s10 + $0x10] sm:$0xff] }
 0x35e   : > { %938 = vmatpush.bf16.msrb.mxu0 %v1731_v14 }
 0x370   : > { %705 = vrot.lane.b32.xlu2 %v667_v0, %s1842_s15 }
 0x3bb   : > { %v695_v15 = vpop.xlane.xlu0 %694 }
 0x3bc   : > { %v696_v16 = vsub.f32 %v691_v8, %v695_v15  ;;  %v1730_v15 = vld [vmem:[%s2178_s10 + $0x8] sm:$0xff] }
 0x3bd   : > { %939 = vmatpush.bf16.msrb.mxu0 %v1730_v15 }
 0x3be   : > { %v697_v17 = vmul.f32 1.442695, %v696_v16  ;;  %v1729_v16 = vld [vmem:[%s2178_s10] sm:$0xff] }
 0x3c0   : > { %1781 = vpow2.f32 %v697_v17  ;;  %v1774_v17 = vld [vmem:[%s2177_s9] ss:$0 sm:$0xff] }
 0x3c1   : > { %940 = vmatpush.bf16.msrb.mxu0 %v1729_v16 }
 0x3c6   : > { %v1782_v18 = vpop.eup %1781 }
 0x3c7   : > { %v699_v19 = vsel %vm692_vm8, %v1782_v18, 0.0 }
 0x3c8   : > { %700 = vadd.xlane.f32.xlu0 %v699_v19 }
 0x3cb   : > { %v754_v20 = vpop.xlane.xlu2 %753 }
 0x3cc   : > { %v755_v21 = vsub.f32 %v751_v12, %v754_v20 }
 0x3ce   : > { %v756_v22 = vmul.f32 1.442695, %v755_v21  ;;  %v765_v23 = vpop.permute.xlu0 %764 }
 0x3cf   : > { %v770_v24 = vsel %vm711_vm9, %v765_v23, 0 }
 0x3d0   : > { %1783 = vpow2.f32 %v756_v22  ;;  %779 = vmatpush.bf16.msrb.mxu1 %v770_v24 }
 0x3d3   : > { %v706_v25 = vpop.permute.xlu2 %705 }
 0x3d4   : > { %v713_v26 = vsel %vm711_vm9, %v706_v25, 0 }
 0x3d5   : > { %722 = vmatpush.bf16.msrb.mxu2 %v713_v26 }
 0x3d6   : > { %v1784_v28 = vpop.eup %1783 }
 0x3d7   : > { %v758_v29 = vsel %vm692_vm8, %v1784_v28, 0.0 }
 0x3d8   : > { %759 = vadd.xlane.f32.xlu1 %v758_v29 }
 0x3d9   : > { %816 = vmatpush.bf16.msra.mxu2 %v1726_v39 }
 0x3dd   : > { %817 = vmatpush.bf16.msra.mxu2 %v1725_v44  ;;  %v1733_v44 = vld [vmem:[%s2172_s4 + $0x10] sm:$0xff] }
 0x43b   : > { %v701_v30 = vpop.xlane.xlu0 %700 }
 0x43c   : > { %1785 = vrcp.f32 %v701_v30 }
 0x442   : > { %v1786_v31 = vpop.eup %1785 }
 0x443   : > { %v703_v32 = vmul.f32 %v1786_v31, %v1782_v18 }
 0x445   : > { %v704_v33 = vpack.c.bf16 %v703_v32, %v703_v32  ;;  %v905_v32 = vperm.slane %v1994_v52, 5  ;;  %v1734_v52 = vld [vmem:[%s2172_s4 + $0x18] sm:$0xff] }
 0x446   : > { %1004 = vmatpush.bf16.msra.mxu1 %v1734_v52 }
 0x447   : > { %1585 = vmatmul.msk.bf16.vlgmr.msrb.gmra.mxu2 %vm707_vm10, %v704_v33 }
 0x44a   : > { %1005 = vmatpush.bf16.msra.mxu1 %v1733_v44 }
 0x44b   : > { %v760_v34 = vpop.xlane.xlu1 %759 }
 0x44c   : > { %1787 = vrcp.f32 %v760_v34 }
 0x452   : > { %v1788_v35 = vpop.eup %1787 }
 0x453   : > { %v762_v37 = vmul.f32 %v1788_v35, %v1784_v28 }
 0x455   : > { %v763_v38 = vpack.c.bf16 %v762_v37, %v762_v37 }
 0x457   : > { %1587 = vmatmul.msk.bf16.vlgmr.msrb.gmra.mxu1 %vm707_vm10, %v763_v38 }
 0x4ca   : > { %v724_v40 = vpop.f32.mrf.mxu2 }
 0x4d2   : > { %v726_v41 = vpop.f32.mrf.mxu2 }
 0x4d4   : > { %v781_v42 = vpop.f32.mrf.mxu1 }
 0x4d5   : > { %786 = vrot.lane.b32.xlu1 %v781_v42, %s2182_s20 }
 0x4dc   : > { %v783_v43 = vpop.f32.mrf.mxu1 }
 0x547   : > { %v787_v45 = vpop.permute.xlu1 %786 }
 0x548   : > { %v789_v46 = vsel %vm671_vm7, %v724_v40, %v787_v45 }
 0x549   : > { %v790_v47 = vpack.c.bf16 %v789_v46, %v789_v46 }
 0x54b   : > { %1596 = vmatmul.msk.bf16.vlgmr.msra.gmra.mxu2 %vm650_vm6, %v790_v47 }
 0x5ce   : > { %v819_v49 = vpop.f32.mrf.mxu2 }
 0x5cf   : > { %v823_v50 = vadd.f32 %v819_v49, %v1975_v27  ;;  %v1727_v27 = vld [vmem:[%s2176_s8] sm:$0xff] }
 0x5d0   : > { %881 = vmatpush.bf16.msra.mxu3 %v1727_v27 }
 0x5d1   : > { %v825_v51 = vadd.f32 %v824_v48, %v823_v50 }
 0x5d3   : > { %v826_v53 = vsel %vm597_vm1, %v825_v51, 0.0 }
 0x5d4   : > { %827 = vadd.xlane.f32.xlu2 %v826_v53  ;;  %v2077_v53 = vld [vmem:[%s2175_s7 + $0x8] sm:$0x3f] }
 0x5d6   : > { %v821_v54 = vpop.f32.mrf.mxu2 }
 0x647   : > { %v828_v55 = vpop.xlane.xlu2 %827 }
 0x648   : > { %v829_v56 = vmul.f32 %v828_v55, %v1979_v36 }
 0x64a   : > { %v830_v57 = vsub.f32 %v825_v51, %v829_v56  ;;  %v971_v56 = vperm.slane %v2077_v53, 0 }
 0x64c   : > { %v831_v58 = vmul.f32 %v830_v57, %v830_v57 }
 0x64e   : > { %v832_v59 = vsel %vm597_vm1, %v831_v58, 0.0 }
 0x64f   : > { %833 = vadd.xlane.f32.xlu1 %v832_v59  ;;  %v973_v59 = vperm.slane %v2077_v53, 1 }
 0x6c2   : > { %v834_v61 = vpop.xlane.xlu1 %833 }
 0x6c3   : > { %v835_v62 = vmul.f32 %v834_v61, %v1979_v36 }
 0x6c5   : > { %v836_v63 = vadd.f32 1e-06, %v835_v62  ;;  %v1775_v62 = vld [vmem:[%s2173_s5 + $0x1] ss:$0 sm:$0xff] }
 0x6c7   : > { %1789 = vrsqrt.f32 %v836_v63  ;;  %vm843_vm12 = vweird.f32 %v836_v63 }
 0x6cd   : > { %v1790_v0 = vpop.eup %1789 }
 0x6ce   : > { %v838_v1 = vmul.f32 %v1790_v0, %v836_v63  ;;  %vm844_vm11 = vweird.f32 %v1790_v0 }
 0x6cf   : > { %vm845_vm13 = vmor %vm843_vm12, %vm844_vm11 }
 0x6d0   : > { %v839_v2 = vmul.f32 %v1790_v0, %v838_v1 }
 0x6d2   : > { %v840_v3 = vmul.f32 0.5, %v839_v2 }
 0x6d4   : > { %v841_v4 = vsub.f32 1.5, %v840_v3 }
 0x6d6   : > { %v842_v5 = vmul.f32 %v1790_v0, %v841_v4 }
 0x6d8   : > { %v846_v7 = vsel %vm845_vm13, %v1790_v0, %v842_v5 }
 0x6d9   : > { %v847_v8 = vmul.f32 %v846_v7, %v830_v57 }
 0x6db   : > { %v849_v10 = vmul.f32 %v848_v6, %v847_v8 }
 0x6dd   : > { %v851_v11 = vadd.f32 %v850_v9, %v849_v10 }
 0x6df   : > { %v852_v12 = vpack.c.bf16 %v851_v11, %v851_v11 }
 0x6e1   : > { %1605 = vmatmul.msk.bf16.vlgmr.msra.gmra.mxu3 %vm650_vm6, %v852_v12 }
 0x764   : > { %v883_v18 = vpop.f32.mrf.mxu3 }
 0x765   : > { %v884_v19 = vadd.f32 %v1774_v17, %v883_v18 }
 0x767   : > { %v887_v20 = vmul.f32 %v884_v19, %v884_v19 }
 0x769   : > { %v888_v21 = vmul.f32 %v887_v20, %v884_v19 }
 0x76b   : > { %v889_v22 = vmul.f32 0.044715, %v888_v21 }
 0x76c   : > { %v885_v23 = vpop.f32.mrf.mxu3 }
 0x76d   : > { %v890_v24 = vadd.f32 %v889_v22, %v884_v19 }
 0x76f   : > { %v891_v25 = vmul.f32 0.7978846, %v890_v24 }
 0x771   : > { %1791 = vtanh.f32 %v891_v25 }
 0x777   : > { %v1792_v26 = vpop.eup %1791 }
 0x778   : > { %v893_v28 = vadd.f32 1.0, %v1792_v26 }
 0x77a   : > { %v894_v29 = vmul.f32 0.5, %v893_v28 }
 0x77c   : > { %v895_v30 = vmul.f32 %v894_v29, %v884_v19 }
 0x77e   : > { %v896_v31 = vpack.c.bf16 %v895_v30, %v895_v30 }
 0x780   : > { %1622 = vmatmul.msk.bf16.vlgmr.msrb.gmra.mxu0 %vm566_vm0, %v896_v31 }
 0x7fd   : > { %v942_v33 = vpop.f32.mrf.mxu0 }
 0x7fe   : > { %v943_v34 = vadd.f32 %v942_v33, %v905_v32 }
 0x800   : > { %v2060_v35 = vadd.f32 %v943_v34, %v825_v51 }
 0x802   : > { %v949_v37 = vsel %vm597_vm1, %v2060_v35, 0.0 }
 0x803   : > { %950 = vadd.xlane.f32.xlu0 %v949_v37 }
 0x805   : > { %v944_v38 = vpop.f32.mrf.mxu0 }
 0x876   : > { %v951_v39 = vpop.xlane.xlu0 %950 }
 0x877   : > { %v952_v40 = vmul.f32 %v951_v39, %v1979_v36 }
 0x879   : > { %v953_v41 = vsub.f32 %v2060_v35, %v952_v40 }
 0x87b   : > { %v954_v42 = vmul.f32 %v953_v41, %v953_v41 }
 0x87d   : > { %v955_v43 = vsel %vm597_vm1, %v954_v42, 0.0 }
 0x87e   : > { %956 = vadd.xlane.f32.xlu0 %v955_v43 }
 0x8f1   : > { %v957_v45 = vpop.xlane.xlu0 %956 }
 0x8f2   : > { %v958_v46 = vmul.f32 %v957_v45, %v1979_v36  ;;  %v1735_v45 = vld [vmem:[%s2174_s6 + $0x10] sm:$0xff] }
 0x8f4   : > { %v959_v47 = vadd.f32 1e-06, %v958_v46 }
 0x8f6   : > { %1793 = vrsqrt.f32 %v959_v47  ;;  %vm966_vm15 = vweird.f32 %v959_v47 }
 0x8fc   : > { %v1794_v48 = vpop.eup %1793 }
 0x8fd   : > { %v961_v49 = vmul.f32 %v1794_v48, %v959_v47  ;;  %vm967_vm14 = vweird.f32 %v1794_v48 }
 0x8fe   : > { %vm968_vm2 = vmor %vm966_vm15, %vm967_vm14 }
 0x8ff   : > { %v962_v50 = vmul.f32 %v1794_v48, %v961_v49  ;;  %v1165_v49 = vperm.slane %v2077_v53, 2 }
 0x901   : > { %v963_v51 = vmul.f32 0.5, %v962_v50 }
 0x903   : > { %v964_v54 = vsub.f32 1.5, %v963_v51 }
 0x905   : > { %v965_v55 = vmul.f32 %v1794_v48, %v964_v54 }
 0x907   : > { %v969_v57 = vsel %vm968_vm2, %v1794_v48, %v965_v55 }
 0x908   : > { %v970_v58 = vmul.f32 %v969_v57, %v953_v41  ;;  %v1736_v41 = vld [vmem:[%s2174_s6 + $0x18] sm:$0xff] }
 0x90a   : > { %v972_v60 = vmul.f32 %v971_v56, %v970_v58 }
 0x90c   : > { %v974_v27 = vadd.f32 %v973_v59, %v972_v60 }
 0x90e   : > { %v975_v61 = vpack.c.bf16 %v974_v27, %v974_v27 }
 0x910   : > { %1636 = vmatmul.msk.bf16.vlgmr.msra.gmra.mxu1 %vm650_vm6, %v975_v61  ;;  %v1738_v61 = vld [vmem:[%s2176_s8 + $0x18] sm:$0xff] }
 0x98d   : > { %v1007_v63 = vpop.f32.mrf.mxu1 }
 0x98e   : > { %v1008_v0 = vadd.f32 %v1775_v62, %v1007_v63 }
 0x990   : > { %v1011_v1 = vpack.c.bf16 %v1008_v0, %v1008_v0 }
 0x992   : > { %1068 = vrot.lane.b32.xlu2 %v1011_v1, %s1838_s28  ;;  %1070 = vrot.lane.b32.xlu0 %v1011_v1, %s1840_s30  ;;  %s2183_s30 = smov 16  }
 0x995   : > { %v1009_v2 = vpop.f32.mrf.mxu1 }
 0x99a   : > { %1104 = vrot.lane.b32.xlu2 %v1011_v1, %s1841_s14  ;;  %1013 = vrot.lane.b32.xlu0 %v1011_v1, %s1839_s29 }
 0x9a2   : > { %1047 = vrot.lane.b32.xlu2 %v1011_v1, %s1842_s15 }
 0x9ec   : > { %v1069_v3 = vpop.permute.xlu2 %1068 }
 0x9f4   : > { %v1105_v4 = vpop.permute.xlu2 %1104 }
 0x9f5   : > { %v1110_v5 = vsel %vm711_vm9, %v1105_v4, 0 }
 0x9f6   : > { %1119 = vmatpush.bf16.msrb.mxu1 %v1110_v5 }
 0x9fc   : > { %v1048_v6 = vpop.permute.xlu2 %1047 }
 0x9fd   : > { %v1053_v7 = vsel %vm711_vm9, %v1048_v6, 0  ;;  %vm1394_vm9 = vcmask 1043456  }
 0x9fe   : > { %1062 = vmatpush.bf16.msrb.mxu3 %v1053_v7  ;;  %v1189_v7 = vperm.slane %v2077_v53, 3 }
 0xa02   : > { %1222 = vmatpush.bf16.msra.mxu3 %v1738_v61 }
 0xa04   : > { %v1071_v8 = vpop.permute.xlu0 %1070 }
 0xa05   : > { %v1076_v9 = vsel %vm671_vm7, %v1071_v8, 0 }
 0xa06   : > { %1085 = vmatpush.bf16.xpose.msra.mxu0 %v1076_v9 }
 0xa0c   : > { %v1014_v10 = vpop.permute.xlu0 %1013 }
 0xa0d   : > { %v1019_v11 = vsel %vm671_vm7, %v1014_v10, 0  ;;  %1639 = vmatmul.msk.bf16.vlgmr.msra.gmra.mxu0 %vm671_vm7, %v1069_v3  ;;  %v1191_v10 = vperm.slane %v2077_v53, 4 }
 0xa0e   : > { %1028 = vmatpush.bf16.xpose.msrb.mxu2 %v1019_v11 }
 0xa15   : > { %1637 = vmatmul.msk.bf16.vlgmr.msrb.gmra.mxu2 %vm671_vm7, %v1011_v1 }
 0xa16   : > { %1157 = vmatpush.bf16.msra.mxu2 %v1736_v41 }
 0xa1a   : > { %1158 = vmatpush.bf16.msra.mxu2 %v1735_v45  ;;  %v1744_v45 = vld [vmem:[%s2179_s11 + $0x8] sm:$0xff] }
 0xa1b   : > { %1345 = vmatpush.bf16.msra.mxu1 %v1744_v45 }
 0xa8a   : > { %v1087_v12 = vpop.f32.mrf.mxu0 }
 0xa8b   : > { %v1091_v13 = vmul.f32 0.25, %v1087_v12 }
 0xa8d   : > { %v1092_v14 = vsel %vm692_vm8, %v1091_v13, -inf }
 0xa8e   : > { %1093 = vmax.xlane.f32.xlu1 %v1092_v14  ;;  %v1742_v14 = vld [vmem:[%s2178_s10 + $0x38] sm:$0xff] }
 0xa8f   : > { %1280 = vmatpush.bf16.msrb.mxu0 %v1742_v14 }
 0xa92   : > { %v1089_v15 = vpop.f32.mrf.mxu0 }
 0xa93   : > { %v1741_v15 = vld [vmem:[%s2178_s10 + $0x30] sm:$0xff] }
 0xa94   : > { %1281 = vmatpush.bf16.msrb.mxu0 %v1741_v15 }
 0xa98   : > { %v1030_v16 = vpop.f32.mrf.mxu2 }
 0xa99   : > { %v1034_v17 = vmul.f32 0.25, %v1030_v16  ;;  %v1740_v16 = vld [vmem:[%s2178_s10 + $0x28] sm:$0xff] }
 0xa9a   : > { %1282 = vmatpush.bf16.msrb.mxu0 %v1740_v16 }
 0xa9b   : > { %v1035_v18 = vsel %vm692_vm8, %v1034_v17, -inf }
 0xa9c   : > { %1036 = vmax.xlane.f32.xlu0 %v1035_v18  ;;  %v1776_v18 = vld [vmem:[%s2177_s9 + $0x1] ss:$0 sm:$0xff] }
 0xaa0   : > { %v1032_v19 = vpop.f32.mrf.mxu2 }
 0xb01   : > { %v1094_v20 = vpop.xlane.xlu1 %1093 }
 0xb02   : > { %v1095_v21 = vsub.f32 %v1091_v13, %v1094_v20 }
 0xb04   : > { %v1096_v22 = vmul.f32 1.442695, %v1095_v21 }
 0xb06   : > { %1795 = vpow2.f32 %v1096_v22 }
 0xb0c   : > { %v1796_v23 = vpop.eup %1795 }
 0xb0d   : > { %v1098_v24 = vsel %vm692_vm8, %v1796_v23, 0.0 }
 0xb0e   : > { %1099 = vadd.xlane.f32.xlu1 %v1098_v24 }
 0xb0f   : > { %v1037_v25 = vpop.xlane.xlu0 %1036 }
 0xb10   : > { %v1038_v26 = vsub.f32 %v1034_v17, %v1037_v25  ;;  %v1739_v17 = vld [vmem:[%s2178_s10 + $0x20] sm:$0xff] }
 0xb11   : > { %1283 = vmatpush.bf16.msrb.mxu0 %v1739_v17 }
 0xb12   : > { %v1039_v28 = vmul.f32 1.442695, %v1038_v26 }
 0xb14   : > { %1797 = vpow2.f32 %v1039_v28 }
 0xb1a   : > { %v1798_v29 = vpop.eup %1797 }
 0xb1b   : > { %v1041_v30 = vsel %vm692_vm8, %v1798_v29, 0.0 }
 0xb1c   : > { %1042 = vadd.xlane.f32.xlu1 %v1041_v30 }
 0xb81   : > { %v1100_v31 = vpop.xlane.xlu1 %1099 }
 0xb82   : > { %1799 = vrcp.f32 %v1100_v31 }
 0xb88   : > { %v1800_v32 = vpop.eup %1799 }
 0xb89   : > { %v1102_v33 = vmul.f32 %v1800_v32, %v1796_v23 }
 0xb8b   : > { %v1103_v34 = vpack.c.bf16 %v1102_v33, %v1102_v33  ;;  %v1248_v33 = vperm.slane %v2077_v53, 5  ;;  %v1743_v53 = vld [vmem:[%s2179_s11] sm:$0xff] }
 0xb8c   : > { %1346 = vmatpush.bf16.msra.mxu1 %v1743_v53 }
 0xb8d   : > { %1640 = vmatmul.msk.bf16.vlgmr.msrb.gmra.mxu1 %vm707_vm10, %v1103_v34 }
 0xb8f   : > { %v1043_v37 = vpop.xlane.xlu1 %1042 }
 0xb90   : > { %1801 = vrcp.f32 %v1043_v37 }
 0xb96   : > { %v1802_v38 = vpop.eup %1801 }
 0xb97   : > { %v1045_v39 = vmul.f32 %v1802_v38, %v1798_v29 }
 0xb99   : > { %v1046_v40 = vpack.c.bf16 %v1045_v39, %v1045_v39 }
 0xb9b   : > { %1638 = vmatmul.msk.bf16.vlgmr.msrb.gmra.mxu3 %vm707_vm10, %v1046_v40 }
 0xc0a   : > { %v1121_v42 = vpop.f32.mrf.mxu1 }
 0xc0b   : > { %1126 = vrot.lane.b32.xlu1 %v1121_v42, %s2183_s30 }
 0xc12   : > { %v1123_v43 = vpop.f32.mrf.mxu1 }
 0xc1e   : > { %v1064_v52 = vpop.f32.mrf.mxu3 }
 0xc26   : > { %v1066_v44 = vpop.f32.mrf.mxu3 }
 0xc7d   : > { %v1127_v46 = vpop.permute.xlu1 %1126 }
 0xc7e   : > { %v1129_v47 = vsel %vm671_vm7, %v1064_v52, %v1127_v46 }
 0xc7f   : > { %v1130_v48 = vpack.c.bf16 %v1129_v47, %v1129_v47 }
 0xc81   : > { %1653 = vmatmul.msk.bf16.vlgmr.msra.gmra.mxu2 %vm650_vm6, %v1130_v48 }
 0xd04   : > { %v1160_v50 = vpop.f32.mrf.mxu2 }
 0xd05   : > { %v1164_v51 = vadd.f32 %v1160_v50, %v2060_v35  ;;  %v1737_v35 = vld [vmem:[%s2176_s8 + $0x10] sm:$0xff] }
 0xd06   : > { %1223 = vmatpush.bf16.msra.mxu3 %v1737_v35 }
 0xd07   : > { %v1166_v54 = vadd.f32 %v1165_v49, %v1164_v51 }
 0xd09   : > { %v1167_v55 = vsel %vm597_vm1, %v1166_v54, 0.0 }
 0xd0a   : > { %1168 = vadd.xlane.f32.xlu2 %v1167_v55  ;;  %v1692_v55 = vld [vmem:[%s2175_s7 + $0x10] sm:$0x3f] }
 0xd0c   : > { %v1162_v56 = vpop.f32.mrf.mxu2 }
 0xd7d   : > { %v1169_v57 = vpop.xlane.xlu2 %1168 }
 0xd7e   : > { %v1170_v58 = vmul.f32 %v1169_v57, %v1979_v36 }
 0xd80   : > { %v1171_v59 = vsub.f32 %v1166_v54, %v1170_v58  ;;  %v1314_v58 = vperm.slane %v1692_v55, 0 }
 0xd82   : > { %v1172_v60 = vmul.f32 %v1171_v59, %v1171_v59 }
 0xd84   : > { %v1173_v27 = vsel %vm597_vm1, %v1172_v60, 0.0 }
 0xd85   : > { %1174 = vadd.xlane.f32.xlu0 %v1173_v27  ;;  %v1316_v27 = vperm.slane %v1692_v55, 1 }
 0xdf8   : > { %v1175_v62 = vpop.xlane.xlu0 %1174 }
 0xdf9   : > { %v1176_v63 = vmul.f32 %v1175_v62, %v1979_v36  ;;  %v1389_v62 = vld.sshfl [vmem:[#allocation1] sm:$0xff pattern:$0x75316420] }
 0xdfa   : > { %1704 = vmatpush.msk.msrb.mxu3 %vm1394_vm9, %v1389_v62 }
 0xdfb   : > { %v1177_v0 = vadd.f32 1e-06, %v1176_v63  ;;  %v1844_v63 = vmov 0  }
 0xdfc   : > { %1772 = vset.pattern.permute.xlu0 %v1844_v63 }
 0xdfd   : > { %1803 = vrsqrt.f32 %v1177_v0  ;;  %vm1184_vm4 = vweird.f32 %v1177_v0 }
 0xe03   : > { %v1804_v1 = vpop.eup %1803 }
 0xe04   : > { %v1179_v2 = vmul.f32 %v1804_v1, %v1177_v0  ;;  %vm1185_vm3 = vweird.f32 %v1804_v1  ;;  %v1390_v0 = vld.sshfl [vmem:[#allocation1 + $0x8] sm:$0xff pattern:$0x75316420] }
 0xe05   : > { %vm1186_vm5 = vmor %vm1184_vm4, %vm1185_vm3  ;;  %1706 = vmatpush.msk.msra.mxu0 %vm1394_vm9, %v1390_v0 }
 0xe06   : > { %v1180_v3 = vmul.f32 %v1804_v1, %v1179_v2 }
 0xe08   : > { %v1181_v4 = vmul.f32 0.5, %v1180_v3 }
 0xe0a   : > { %v1182_v5 = vsub.f32 1.5, %v1181_v4 }
 0xe0c   : > { %v1183_v6 = vmul.f32 %v1804_v1, %v1182_v5  ;;  %v1357_v5 = vrot.slane %v1692_v55, 3 }
 0xe0e   : > { %v1187_v8 = vsel %vm1186_vm5, %v1804_v1, %v1183_v6  ;;  %v1323_v1 = vperm.slane %v1692_v55, 2 }
 0xe0f   : > { %v1188_v9 = vmul.f32 %v1187_v8, %v1171_v59 }
 0xe11   : > { %v1190_v11 = vmul.f32 %v1189_v7, %v1188_v9 }
 0xe13   : > { %v1192_v12 = vadd.f32 %v1191_v10, %v1190_v11 }
 0xe15   : > { %v1193_v13 = vpack.c.bf16 %v1192_v12, %v1192_v12  ;;  %v1445_v12 = vlaneseq }
 0xe17   : > { %1666 = vmatmul.msk.bf16.vlgmr.msra.gmra.mxu3 %vm650_vm6, %v1193_v13  ;;  %vm1447_vm11 = vcmp.lt.s32.totalorder %v1445_v12, 256 }
 0xe9a   : > { %v1225_v19 = vpop.f32.mrf.mxu3 }
 0xe9b   : > { %v1226_v20 = vadd.f32 %v1776_v18, %v1225_v19 }
 0xe9d   : > { %v1229_v21 = vmul.f32 %v1226_v20, %v1226_v20 }
 0xe9f   : > { %v1230_v22 = vmul.f32 %v1229_v21, %v1226_v20 }
 0xea1   : > { %v1231_v23 = vmul.f32 0.044715, %v1230_v22 }
 0xea2   : > { %v1227_v24 = vpop.f32.mrf.mxu3 }
 0xea3   : > { %v1232_v25 = vadd.f32 %v1231_v23, %v1226_v20 }
 0xea5   : > { %v1233_v26 = vmul.f32 0.7978846, %v1232_v25 }
 0xea7   : > { %1805 = vtanh.f32 %v1233_v26 }
 0xead   : > { %v1806_v28 = vpop.eup %1805 }
 0xeae   : > { %v1235_v29 = vadd.f32 1.0, %v1806_v28 }
 0xeb0   : > { %v1236_v30 = vmul.f32 0.5, %v1235_v29 }
 0xeb2   : > { %v1237_v31 = vmul.f32 %v1236_v30, %v1226_v20 }
 0xeb4   : > { %v1238_v32 = vpack.c.bf16 %v1237_v31, %v1237_v31 }
 0xeb6   : > { %1691 = vmatmul.msk.bf16.vlgmr.msrb.gmra.mxu0 %vm566_vm0, %v1238_v32 }
 0xf33   : > { %v1285_v34 = vpop.f32.mrf.mxu0 }
 0xf34   : > { %v1286_v37 = vadd.f32 %v1285_v34, %v1248_v33 }
 0xf36   : > { %v1289_v38 = vadd.f32 %v1286_v37, %v1166_v54 }
 0xf38   : > { %v1292_v39 = vsel %vm597_vm1, %v1289_v38, 0.0 }
 0xf39   : > { %1293 = vadd.xlane.f32.xlu1 %v1292_v39 }
 0xf3b   : > { %v1287_v40 = vpop.f32.mrf.mxu0 }
 0xfac   : > { %v1294_v41 = vpop.xlane.xlu1 %1293 }
 0xfad   : > { %v1295_v42 = vmul.f32 %v1294_v41, %v1979_v36 }
 0xfaf   : > { %v1296_v43 = vsub.f32 %v1289_v38, %v1295_v42 }
 0xfb1   : > { %v1297_v52 = vmul.f32 %v1296_v43, %v1296_v43 }
 0xfb3   : > { %v1298_v44 = vsel %vm597_vm1, %v1297_v52, 0.0 }
 0xfb4   : > { %1299 = vadd.xlane.f32.xlu0 %v1298_v44 }
 0xfc8   : > { %1355 = vperm.xlu0 %1772, %v1692_v55  }
0x1027   : > { %v1300_v46 = vpop.xlane.xlu0 %1299 }
0x1028   : > { %v1301_v47 = vmul.f32 %v1300_v46, %v1979_v36 }
0x102a   : > { %v1302_v48 = vadd.f32 1e-06, %v1301_v47 }
0x102c   : > { %1807 = vrsqrt.f32 %v1302_v48  ;;  %vm1309_vm1 = vweird.f32 %v1302_v48 }
0x1032   : > { %v1808_v49 = vpop.eup %1807 }
0x1033   : > { %v1304_v50 = vmul.f32 %v1808_v49, %v1302_v48  ;;  %vm1310_vm0 = vweird.f32 %v1808_v49 }
0x1034   : > { %vm1311_vm8 = vmor %vm1309_vm1, %vm1310_vm0 }
0x1035   : > { %v1305_v51 = vmul.f32 %v1808_v49, %v1304_v50 }
0x1037   : > { %v1306_v54 = vmul.f32 0.5, %v1305_v51 }
0x1039   : > { %v1307_v56 = vsub.f32 1.5, %v1306_v54 }
0x103a   : > { %v1356_v7 = vpop.permute.xlu0 %1355 }
0x103b   : > { %v1308_v57 = vmul.f32 %v1808_v49, %v1307_v56  ;;  %v1358_v8 = vrot.slane %v1356_v7, 4 }
0x103d   : > { %v1312_v59 = vsel %vm1311_vm8, %v1808_v49, %v1308_v57 }
0x103e   : > { %v1313_v60 = vmul.f32 %v1312_v59, %v1296_v43 }
0x1040   : > { %v1315_v36 = vmul.f32 %v1314_v58, %v1313_v60 }
0x1042   : > { %v1317_v61 = vadd.f32 %v1316_v27, %v1315_v36 }
0x1044   : > { %v1318_v35 = vpack.c.bf16 %v1317_v61, %v1317_v61 }
0x1046   : > { %1701 = vmatmul.msk.bf16.vlgmr.msra.gmra.mxu1 %vm650_vm6, %v1318_v35  ;;  %vm1442_vm6 = vcmask 1040384  }
0x10c3   : > { %v1348_v2 = vpop.f32.mrf.mxu1 }
0x10c4   : > { %v1349_v3 = vadd.f32 %v1348_v2, %v1323_v1 }
0x10c6   : > { %v1352_v4 = vmax.f32 %v1349_v3, 0.0 }
0x10c8   : > { %1702 = vmatpush.xpose.msk.msrb.mxu2 %vm671_vm7, %v1352_v4 }
0x10cb   : > { %v1350_v6 = vpop.f32.mrf.mxu1  ;;  %1703 = vmatmul.msk.f32.vlgmr.msrb.gmra.mxu2 %vm671_vm7, %v1357_v5 }
0x114e   : > { %v1382_v9 = vpop.f32.mrf.mxu2 }
0x114f   : > { %v1383_v10 = vadd.f32 %v1382_v9, %v1358_v8 }
0x1151   : > { %v1385_v11 = vmax.f32 %v1383_v10, 0.0 }
0x1153   : > { %1705 = vmatmul.msk.f32.vlgmr.msrb.gmra.mxu3 %vm707_vm10, %v1385_v11  ;;  %1707 = vmatmul.msk.f32.vlgmr.msra.gmra.mxu0 %vm707_vm10, %v1385_v11 }
0x11d0   : > { %v1436_v13 = vpop.f32.mrf.mxu0 }
0x11d1   : > { %v1441_v14 = vrot.slane %v1436_v13, 7 }
0x11d6   : > { %v1416_v15 = vpop.f32.mrf.mxu3 }
0x11d7   : > { %v1443_v16 = vsel %vm1442_vm6, %v1416_v15, %v1441_v14 }
0x11d8   : > { %1449 = vst.msk [vmem:[%s452_s16] sm:$0x3] %vm1447_vm11, %v1443_v16 }
0x11d9 PF: > { %s24_s25 = sadd.s32 1, %s1834_s25  }
0x11da   : > { %p21_p7 = scmp.ge.s32.totalorder %s24_s25, 4  }
0x11dc   :  { %23 = sbr.rel (!%p21_p7) target bundleno = 1 (0x1), region = 113 }
0x11e1   :  { %1469 = vsyncpa [#allocation3], 1 }
0x11e2   :  { %1471 = vsyncpa [#allocation3 + $0x1], 1 }

</bundles_post_ra>
